<compile_context>
chip_gen: v6e
topology: v6e:2x2x1
jax: 0.10.0
libtpu: 0.0.40
codegen_flags: <defaults>
</compile_context>

<pallas_src>
import functools

import jax
import jax.numpy as jnp
from jax.experimental import pallas as pl
from jax.experimental.pallas import tpu as pltpu

_INV_SQRT2 = 0.7071067811865476  # 1 / sqrt(2), compile-time constant
_LN_EPS = 1e-12


def _ffn_ln_kernel(x_ref, w1_ref, b1_ref, w2_ref, b2_ref, g_ref, beta_ref,
                   o_ref, acc_ref):
    """One (batch-tile, F-chunk) grid step.

    grid = (B/TB, F/TF); the F axis is last and 'arbitrary' (reduction into
    acc_ref).  x / out / b2 / gamma / beta keep a constant block index across
    the F axis (VMEM-resident); w1 / b1 / w2 stream one TF-wide chunk per step.
    """
    f = pl.program_id(1)

    @pl.when(f == 0)
    def _init():
        acc_ref[...] = jnp.zeros_like(acc_ref)

    # Load the x tile exactly once; derive both precisions from that value.
    xv = x_ref[...]
    x_b16 = xv.astype(jnp.bfloat16)

    # Linear 1 chunk on the MXU: (TB, H) @ (H, TF) -> f32 accumulation.
    h = jnp.dot(x_b16, w1_ref[...], preferred_element_type=jnp.float32)
    h = h + b1_ref[...].astype(jnp.float32)

    # Exact (erf-based) GELU in f32 — matches torch.nn.functional.gelu default.
    h = 0.5 * h * (1.0 + jax.lax.erf(h * _INV_SQRT2))

    # Linear 2 chunk on the MXU: (TB, TF) @ (TF, H), accumulated in f32.
    acc_ref[...] += jnp.dot(h.astype(jnp.bfloat16), w2_ref[...],
                            preferred_element_type=jnp.float32)

    @pl.when(f == pl.num_programs(1) - 1)
    def _finalize():
        x_f32 = xv.astype(jnp.float32)
        y = acc_ref[...] + b2_ref[...].astype(jnp.float32)
        # Residual + LayerNorm over last dim (biased variance, eps=1e-12), f32.
        z = x_f32 + y
        mean = jnp.mean(z, axis=-1, keepdims=True)
        zc = z - mean
        var = jnp.mean(zc * zc, axis=-1, keepdims=True)
        inv = jax.lax.rsqrt(var + _LN_EPS)
        out = (zc * inv * g_ref[...].astype(jnp.float32)
               + beta_ref[...].astype(jnp.float32))
        o_ref[...] = out.astype(o_ref.dtype)


def _round_up(a, b):
    return ((a + b - 1) // b) * b


@functools.partial(jax.jit, static_argnames=("block_b", "block_f"))
def ffn_layernorm(x, w1, b1, w2, b2, gamma, beta, *, block_b=512, block_f=2048):
    """x: (B, H) f32.  w1: (H, 4H) bf16, w2: (4H, H) bf16 (in, out) layout.
    b1: (1, 4H), b2 / gamma / beta: (1, H) f32."""
    B, H = x.shape
    F = w1.shape[1]                      # 4 * H

    # Batch tile: multiple of 8 (sublane), capped at block_b.
    TB = min(block_b, _round_up(B, 8))
    B_pad = _round_up(B, TB)
    x_in = jnp.pad(x, ((0, B_pad - B), (0, 0))) if B_pad != B else x

    # F (intermediate) chunk: multiples of 256 favoured for the 256-wide
    # v6e/v7x MXU; fall back to the full F when it does not divide evenly.
    TF = F if (F <= block_f or F % block_f != 0) else block_f
    grid = (B_pad // TB, F // TF)

    act_bytes = jnp.dtype(x.dtype).itemsize
    w_bytes = jnp.dtype(w1.dtype).itemsize
    # Real VMEM footprint: double-buffered streamed blocks + resident scratch +
    # headroom for the in-kernel (TB, TF) f32 / bf16 intermediates.
    vmem_bytes = (
        2 * TB * H * act_bytes                 # x tiles
        + 2 * TB * H * act_bytes               # out tiles
        + 2 * (H * TF + TF * H) * w_bytes      # w1 / w2 chunks
        + 2 * (TF + 3 * H) * 4                 # b1 chunk, b2, gamma, beta
        + TB * H * 4                           # f32 accumulator scratch
        + 2 * TB * TF * 4                      # intermediate h (f32 + bf16)
    )
    # Floor gives the compiler headroom at toy shapes; cap stays well inside
    # v7x's 64 MiB per-TC VMEM so scaled-up H never over-asks the chip.
    vmem_limit = int(min(max(vmem_bytes + (2 << 20), 8 << 20), 56 << 20))

    cost = pl.CostEstimate(
        flops=int(4 * B_pad * H * F),           # two matmuls, 2*M*K*N each
        transcendentals=int(B_pad * F),         # one erf per intermediate elem
        bytes_accessed=int(2 * B_pad * H * act_bytes
                           + 2 * H * F * w_bytes
                           + (F + 3 * H) * 4),
    )

    grid_spec = pltpu.PrefetchScalarGridSpec(
        num_scalar_prefetch=0,
        grid=grid,
        in_specs=[
            pl.BlockSpec((TB, H), lambda i, f: (i, 0)),   # x: resident over F
            pl.BlockSpec((H, TF), lambda i, f: (0, f)),   # w1 chunk
            pl.BlockSpec((1, TF), lambda i, f: (0, f)),   # b1 chunk
            pl.BlockSpec((TF, H), lambda i, f: (f, 0)),   # w2 chunk
            pl.BlockSpec((1, H), lambda i, f: (0, 0)),    # b2
            pl.BlockSpec((1, H), lambda i, f: (0, 0)),    # gamma
            pl.BlockSpec((1, H), lambda i, f: (0, 0)),    # beta
        ],
        out_specs=pl.BlockSpec((TB, H), lambda i, f: (i, 0)),
        scratch_shapes=[pltpu.VMEM((TB, H), jnp.float32)],
    )

    out = pl.pallas_call(
        _ffn_ln_kernel,
        out_shape=jax.ShapeDtypeStruct((B_pad, H), x.dtype),
        grid_spec=grid_spec,
        compiler_params=pltpu.CompilerParams(
            dimension_semantics=("parallel", "arbitrary"),
            vmem_limit_bytes=vmem_limit,
        ),
        cost_estimate=cost,
    )(x_in, w1, b1, w2, b2, gamma, beta)

    return out[:B] if B_pad != B else out


if __name__ == "__main__":
    batch, hid_dim = 200, 128   # small demo shape (batch pads to 256 internally)

    key = jax.random.PRNGKey(0)
    kx, k1, k2, k3, k4 = jax.random.split(key, 5)

    x = jax.random.normal(kx, (batch, hid_dim), dtype=jnp.float32)

    # Linear weights stored already-transposed: (in, out); shipped in bf16
    # (the dominant HBM traffic at small batch), biases/LN params in f32.
    w1 = (jax.random.normal(k1, (hid_dim, 4 * hid_dim), dtype=jnp.float32) * 0.02
          ).astype(jnp.bfloat16)
    b1 = jax.random.normal(k2, (1, 4 * hid_dim), dtype=jnp.float32) * 0.02
    w2 = (jax.random.normal(k3, (4 * hid_dim, hid_dim), dtype=jnp.float32) * 0.02
          ).astype(jnp.bfloat16)
    b2 = jax.random.normal(k4, (1, hid_dim), dtype=jnp.float32) * 0.02
    gamma = jnp.ones((1, hid_dim), dtype=jnp.float32)
    beta = jnp.zeros((1, hid_dim), dtype=jnp.float32)

    # Small tiles here purely to exercise both grid axes (batch pipelining and
    # the F-chunked accumulator init/finalize path).  Production defaults are
    # block_b=512, block_f=2048 (single fused F step at small H).
    out = ffn_layernorm(x, w1, b1, w2, b2, gamma, beta,
                        block_b=128, block_f=256)
    jax.block_until_ready(out)

    # Pure-JAX reference with the same numeric contract as the kernel:
    # bf16 MXU inputs, f32 accumulation, exact GELU, biased-variance LayerNorm.
    h_ref = jnp.dot(x.astype(jnp.bfloat16), w1,
                    preferred_element_type=jnp.float32) + b1
    h_ref = 0.5 * h_ref * (1.0 + jax.lax.erf(h_ref * _INV_SQRT2))
    y_ref = jnp.dot(h_ref.astype(jnp.bfloat16), w2,
                    preferred_element_type=jnp.float32) + b2
    z_ref = x + y_ref
    mu = z_ref.mean(-1, keepdims=True)
    var = ((z_ref - mu) ** 2).mean(-1, keepdims=True)
    ref = (z_ref - mu) * jax.lax.rsqrt(var + _LN_EPS) * gamma + beta

    assert out.shape == (batch, hid_dim)
    assert jnp.allclose(out, ref, atol=1e-4, rtol=1e-4), "mismatch vs reference"

    print("KERNEL_OK")
</pallas_src>

<mosaic_0001>
module attributes {stable_mosaic.version = 11 : i64} {
  func.func @_ffn_ln_kernel(%arg0: i32, %arg1: i32, %arg2: memref<128x128xf32, #tpu.memory_space<vmem>>, %arg3: memref<128x256xbf16, #tpu.memory_space<vmem>>, %arg4: memref<1x256xf32, #tpu.memory_space<vmem>>, %arg5: memref<256x128xbf16, #tpu.memory_space<vmem>>, %arg6: memref<1x128xf32, #tpu.memory_space<vmem>>, %arg7: memref<1x128xf32, #tpu.memory_space<vmem>>, %arg8: memref<1x128xf32, #tpu.memory_space<vmem>>, %arg9: memref<128x128xf32, #tpu.memory_space<vmem>>, %arg10: memref<128x128xf32, #tpu.memory_space<vmem>>) attributes {dimension_semantics = [#tpu.dimension_semantics<parallel>, #tpu.dimension_semantics<arbitrary>], iteration_bounds = array<i64: 2, 2>, scalar_prefetch = 0 : i64, scratch_operands = 1 : i64, tpu.core_type = #tpu.core_type<tc>, window_params = [{transform_indices = @transform_0, window_bounds = array<i64: 128, 128>}, {transform_indices = @transform_1, window_bounds = array<i64: 128, 256>}, {transform_indices = @transform_2, window_bounds = array<i64: 1, 256>}, {transform_indices = @transform_3, window_bounds = array<i64: 256, 128>}, {pipeline_mode = #tpu.pipeline_mode<synchronous>, transform_indices = @transform_4, window_bounds = array<i64: 1, 128>}, {pipeline_mode = #tpu.pipeline_mode<synchronous>, transform_indices = @transform_5, window_bounds = array<i64: 1, 128>}, {pipeline_mode = #tpu.pipeline_mode<synchronous>, transform_indices = @transform_6, window_bounds = array<i64: 1, 128>}, {transform_indices = @transform_7, window_bounds = array<i64: 128, 128>}]} {
    %c0_i32 = arith.constant 0 : i32
    %0 = arith.cmpi eq, %arg1, %c0_i32 : i32
    %1 = arith.extui %0 : i1 to i32
    %c0_i32_0 = arith.constant 0 : i32
    %2 = arith.cmpi ne, %1, %c0_i32_0 : i32
    scf.if %2 {
      %cst_17 = arith.constant 0.000000e+00 : f32
      %27 = vector.broadcast %cst_17 : f32 to vector<128x128xf32>
      %c0_18 = arith.constant 0 : index
      %c0_19 = arith.constant 0 : index
      %28 = vector.load %arg10[%c0_18, %c0_19] : memref<128x128xf32, #tpu.memory_space<vmem>>, vector<128x128xf32>
      tpu.vector_store %arg10[%c0_18, %c0_19], %27 {strides = array<i32>} : memref<128x128xf32, #tpu.memory_space<vmem>>, vector<128x128xf32>,
    } else {
    }
    %c0 = arith.constant 0 : index
    %c0_1 = arith.constant 0 : index
    %3 = vector.load %arg2[%c0, %c0_1] : memref<128x128xf32, #tpu.memory_space<vmem>>, vector<128x128xf32>
    %4 = arith.truncf %3 : vector<128x128xf32> to vector<128x128xbf16>
    %c0_2 = arith.constant 0 : index
    %c0_3 = arith.constant 0 : index
    %5 = vector.load %arg3[%c0_2, %c0_3] : memref<128x256xbf16, #tpu.memory_space<vmem>>, vector<128x256xbf16>
    %cst = arith.constant dense<0.000000e+00> : vector<128x256xf32>
    %6 = tpu.matmul %4, %5, %cst {dimension_numbers = #tpu.dot_dimension_numbers<[1], [0], [0], [1], [0, 0, 1, 1], [], []>} : vector<128x128xbf16>, vector<128x256xbf16>, vector<128x256xf32> -> vector<128x256xf32>
    %c0_4 = arith.constant 0 : index
    %c0_5 = arith.constant 0 : index
    %7 = vector.load %arg4[%c0_4, %c0_5] : memref<1x256xf32, #tpu.memory_space<vmem>>, vector<1x256xf32>
    %8 = vector.broadcast %7 : vector<1x256xf32> to vector<128x256xf32>
    %9 = arith.addf %6, %8 : vector<128x256xf32>
    %cst_6 = arith.constant 5.000000e-01 : f32
    %10 = vector.broadcast %cst_6 : f32 to vector<128x256xf32>
    %11 = arith.mulf %10, %9 : vector<128x256xf32>
    %cst_7 = arith.constant 0.707106769 : f32
    %12 = vector.broadcast %cst_7 : f32 to vector<128x256xf32>
    %13 = arith.mulf %9, %12 : vector<128x256xf32>
    %14 = math.erf %13 : vector<128x256xf32>
    %cst_8 = arith.constant 1.000000e+00 : f32
    %15 = vector.broadcast %cst_8 : f32 to vector<128x256xf32>
    %16 = arith.addf %15, %14 : vector<128x256xf32>
    %17 = arith.mulf %11, %16 : vector<128x256xf32>
    %c0_9 = arith.constant 0 : index
    %c0_10 = arith.constant 0 : index
    %18 = vector.load %arg10[%c0_9, %c0_10] : memref<128x128xf32, #tpu.memory_space<vmem>>, vector<128x128xf32>
    %19 = arith.truncf %17 : vector<128x256xf32> to vector<128x256xbf16>
    %c0_11 = arith.constant 0 : index
    %c0_12 = arith.constant 0 : index
    %20 = vector.load %arg5[%c0_11, %c0_12] : memref<256x128xbf16, #tpu.memory_space<vmem>>, vector<256x128xbf16>
    %cst_13 = arith.constant dense<0.000000e+00> : vector<128x128xf32>
    %21 = tpu.matmul %19, %20, %cst_13 {dimension_numbers = #tpu.dot_dimension_numbers<[1], [0], [0], [1], [0, 0, 1, 1], [], []>} : vector<128x256xbf16>, vector<256x128xbf16>, vector<128x128xf32> -> vector<128x128xf32>
    %22 = arith.addf %18, %21 : vector<128x128xf32>
    %c0_14 = arith.constant 0 : index
    %c0_15 = arith.constant 0 : index
    %23 = vector.load %arg10[%c0_14, %c0_15] : memref<128x128xf32, #tpu.memory_space<vmem>>, vector<128x128xf32>
    tpu.vector_store %arg10[%c0_14, %c0_15], %22 {strides = array<i32>} : memref<128x128xf32, #tpu.memory_space<vmem>>, vector<128x128xf32>,
    %c1_i32 = arith.constant 1 : i32
    %24 = arith.cmpi eq, %arg1, %c1_i32 : i32
    %25 = arith.extui %24 : i1 to i32
    %c0_i32_16 = arith.constant 0 : i32
    %26 = arith.cmpi ne, %25, %c0_i32_16 : i32
    scf.if %26 {
      %c0_17 = arith.constant 0 : index
      %c0_18 = arith.constant 0 : index
      %27 = vector.load %arg10[%c0_17, %c0_18] : memref<128x128xf32, #tpu.memory_space<vmem>>, vector<128x128xf32>
      %c0_19 = arith.constant 0 : index
      %c0_20 = arith.constant 0 : index
      %28 = vector.load %arg6[%c0_19, %c0_20] : memref<1x128xf32, #tpu.memory_space<vmem>>, vector<1x128xf32>
      %29 = vector.broadcast %28 : vector<1x128xf32> to vector<128x128xf32>
      %30 = arith.addf %27, %29 : vector<128x128xf32>
      %31 = arith.addf %3, %30 : vector<128x128xf32>
      %cst_21 = arith.constant dense<0.000000e+00> : vector<128xf32>
      %32 = vector.multi_reduction <add>, %31, %cst_21 [1] : vector<128x128xf32> to vector<128xf32>
      %33 = vector.shape_cast %32 : vector<128xf32> to vector<128x1xf32>
      %cst_22 = arith.constant 1.280000e+02 : f32
      %34 = vector.broadcast %cst_22 : f32 to vector<128x1xf32>
      %35 = arith.divf %33, %34 : vector<128x1xf32>
      %36 = vector.broadcast %35 : vector<128x1xf32> to vector<128x128xf32>
      %37 = arith.subf %31, %36 : vector<128x128xf32>
      %38 = arith.mulf %37, %37 : vector<128x128xf32>
      %cst_23 = arith.constant dense<0.000000e+00> : vector<128xf32>
      %39 = vector.multi_reduction <add>, %38, %cst_23 [1] : vector<128x128xf32> to vector<128xf32>
      %40 = vector.shape_cast %39 : vector<128xf32> to vector<128x1xf32>
      %cst_24 = arith.constant 1.280000e+02 : f32
      %41 = vector.broadcast %cst_24 : f32 to vector<128x1xf32>
      %42 = arith.divf %40, %41 : vector<128x1xf32>
      %cst_25 = arith.constant 9.99999996E-13 : f32
      %43 = vector.broadcast %cst_25 : f32 to vector<128x1xf32>
      %44 = arith.addf %42, %43 : vector<128x1xf32>
      %45 = math.rsqrt %44 : vector<128x1xf32>
      %46 = vector.broadcast %45 : vector<128x1xf32> to vector<128x128xf32>
      %47 = arith.mulf %37, %46 : vector<128x128xf32>
      %c0_26 = arith.constant 0 : index
      %c0_27 = arith.constant 0 : index
      %48 = vector.load %arg7[%c0_26, %c0_27] : memref<1x128xf32, #tpu.memory_space<vmem>>, vector<1x128xf32>
      %49 = vector.broadcast %48 : vector<1x128xf32> to vector<128x128xf32>
      %50 = arith.mulf %47, %49 : vector<128x128xf32>
      %c0_28 = arith.constant 0 : index
      %c0_29 = arith.constant 0 : index
      %51 = vector.load %arg8[%c0_28, %c0_29] : memref<1x128xf32, #tpu.memory_space<vmem>>, vector<1x128xf32>
      %52 = vector.broadcast %51 : vector<1x128xf32> to vector<128x128xf32>
      %53 = arith.addf %50, %52 : vector<128x128xf32>
      %c0_30 = arith.constant 0 : index
      %c0_31 = arith.constant 0 : index
      %54 = vector.load %arg9[%c0_30, %c0_31] : memref<128x128xf32, #tpu.memory_space<vmem>>, vector<128x128xf32>
      tpu.vector_store %arg9[%c0_30, %c0_31], %53 {strides = array<i32>} : memref<128x128xf32, #tpu.memory_space<vmem>>, vector<128x128xf32>,
    } else {
    }
    return
  }
  func.func @transform_0(%arg0: i32, %arg1: i32) -> (i32, i32) {
    %c0_i32 = arith.constant 0 : i32
    %c0_i32_0 = arith.constant 0 : i32
    return %arg0, %c0_i32 : i32, i32
  }
  func.func @transform_1(%arg0: i32, %arg1: i32) -> (i32, i32) {
    %c0_i32 = arith.constant 0 : i32
    %c0_i32_0 = arith.constant 0 : i32
    return %c0_i32, %arg1 : i32, i32
  }
  func.func @transform_2(%arg0: i32, %arg1: i32) -> (i32, i32) {
    %c0_i32 = arith.constant 0 : i32
    %c0_i32_0 = arith.constant 0 : i32
    return %c0_i32, %arg1 : i32, i32
  }
  func.func @transform_3(%arg0: i32, %arg1: i32) -> (i32, i32) {
    %c0_i32 = arith.constant 0 : i32
    %c0_i32_0 = arith.constant 0 : i32
    return %arg1, %c0_i32 : i32, i32
  }
  func.func @transform_4(%arg0: i32, %arg1: i32) -> (i32, i32) {
    %c0_i32 = arith.constant 0 : i32
    %c0_i32_0 = arith.constant 0 : i32
    %c0_i32_1 = arith.constant 0 : i32
    return %c0_i32, %c0_i32_0 : i32, i32
  }
  func.func @transform_5(%arg0: i32, %arg1: i32) -> (i32, i32) {
    %c0_i32 = arith.constant 0 : i32
    %c0_i32_0 = arith.constant 0 : i32
    %c0_i32_1 = arith.constant 0 : i32
    return %c0_i32, %c0_i32_0 : i32, i32
  }
  func.func @transform_6(%arg0: i32, %arg1: i32) -> (i32, i32) {
    %c0_i32 = arith.constant 0 : i32
    %c0_i32_0 = arith.constant 0 : i32
    %c0_i32_1 = arith.constant 0 : i32
    return %c0_i32, %c0_i32_0 : i32, i32
  }
  func.func @transform_7(%arg0: i32, %arg1: i32) -> (i32, i32) {
    %c0_i32 = arith.constant 0 : i32
    %c0_i32_0 = arith.constant 0 : i32
    return %arg0, %c0_i32 : i32, i32
  }
}

</mosaic_0001>

<bundles_post_ra>
// kernel: ffn_layernorm.1
= control target key start
LH: loop header
LB: loop body
LE: loop exit
PB: predicated region body
PF: predicated region fallthrough
CT: control target
= control target key end

     0   :  { %s2666_s0 = inlined_call_operand.vmem [shape: f32[256,128], index: 0, kind: input, shape index: {}]   ;;  %s2667_s1 = inlined_call_operand.vmem [shape: bf16[128,512], index: 1, kind: input, shape index: {}]   ;;  %s2668_s2 = inlined_call_operand.vmem [shape: f32[1,512], index: 2, kind: input, shape index: {}]   ;;  %s2669_s3 = inlined_call_operand.hbm [shape: bf16[512,128], index: 3, kind: input, shape index: {}]   ;;  %s2670_s4 = inlined_call_operand.vmem [shape: f32[1,128], index: 4, kind: input, shape index: {}]   ;;  %s2671_s5 = inlined_call_operand.vmem [shape: f32[1,128], index: 5, kind: input, shape index: {}]   ;;  %s2672_s6 = inlined_call_operand.vmem [shape: f32[1,128], index: 6, kind: input, shape index: {}]   ;;  %s2673_s7 = inlined_call_operand.vmem [shape: f32[256,128], index: 7, kind: output, shape index: {}]  }
   0x1   :  { %2674 = sst [smem:[#allocation8_spill]] %s2667_s1 }
   0x2   :  { %12 = vsyncpa [#allocation5], 0 }
   0x3   :  { %14 = vsyncpa [#allocation5 + $0x1], 0  ;;  %s2070_s24 = smov 0   ;;  %s2072_s25 = smov 0  }
   0x4   :  { %s2074_s26 = smov 0   ;;  %s2076_s27 = smov 0  }
   0x5   :  { %s2078_s28 = smov 0   ;;  %s2080_s29 = smov 0  }
   0x6   :  { %s2082_s30 = smov 0   ;;  %s2084_s8 = smov 0  }
   0x7 LB: > { %s1602_s9 = sadd.s32 4294967295, %s2023_s8   ;;  %s29_s10 = sadd.s32 1, %s2015_s29  ;;  %s2023_s8 = sphi %s2084_s8, %s20_s8   ;;  %s2019_s30 = sphi %s2082_s30, %s2686_s30   ;;  %s2015_s29 = sphi %s2080_s29, %s2685_s29   ;;  %s2011_s28 = sphi %s2078_s28, %s2684_s28   ;;  %s2007_s27 = sphi %s2076_s27, %s2683_s27   ;;  %s2003_s26 = sphi %s2074_s26, %s2682_s26   ;;  %s1999_s25 = sphi %s2072_s25, %s2681_s25   ;;  %s1995_s24 = sphi %s2070_s24, %s2680_s24  }
   0x8   : > { %p30_p0 = scmp.ge.s32.totalorder %s29_s10, 2  ;;  %s32_s11 = sadd.s32 1, %s2019_s30 }
   0x9   : > { %s65_s12 = sadd.s32 1, %s2003_s26  ;;  %p72_p1 = scmp.ne.s32.totalorder %s2003_s26, %s1999_s25 }
   0xa   : > { %s2688_s10 = smov (%p30_p0, %s29_s10), 0  ;;  %s2690_s11 = smov (!%p30_p0, %s32_s11), %s2019_s30 }
   0xb   : > { %s62_s13 = ssub.s32 %s2015_s29, %s2688_s10  ;;  %p73_p2 = scmp.eq.s32.totalorder %s2023_s8, 0 }
   0xc   : > { %p34_p3 = scmp.ge.s32.totalorder %s2690_s11, 2  ;;  %p63_p4 = scmp.eq.s32.totalorder %s62_s13, 0 }
   0xd   : > { %p2120_p5 = por %p73_p2, %p72_p1  ;;  %p130_p6 = scmp.ne.s32.totalorder %s1999_s25, %s1995_s24 }
   0xe   : > { %s2692_s11 = smov (%p34_p3, %s2690_s11), 0  ;;  %p131_p7 = scmp.eq.s32.totalorder %s1602_s9, 0 }
   0xf   : > { %2676 = sst [smem:[#allocation7_spill]] %s2692_s11  ;;  %p1605_p9 = scmp.ge.s32.totalorder %s2023_s8, 4 }
  0x10   : > { %s2128_s15 = scalar_select %p63_p4, %s2003_s26, %s65_s12  }
  0x11   : > { %p2130_p8 = por %p131_p7, %p130_p6  ;;  %248 = sbr.rel (%p1605_p9) target bundleno = 56 (0x38), region = 28 }
  0x16   : > { %260 = sbr.rel (!%p2120_p5) target bundleno = 40 (0x28), region = 36  ;;  %s262_s17 = sand.u32 (%p2120_p5), 1, %s2003_s26  }
  0x17   : > { %s1659_s18 = sshll.u32 (%p2120_p5), %s2015_s29, 3  ;;  %s1606_s19 = sshll.u32 (%p2120_p5), %s262_s17, 7 }
  0x18   : > { %s2678_s1 = sld [smem:[#allocation8_spill]] (%p2120_p5)  ;;  %s264_s23 = scalar_lea.vmem (%p2120_p5), [#allocation3], %s1606_s19 }
  0x1e   : > { %s2142_s22 = scalar_lea.vmem %s2678_s1, %s1659_s18 }
  0x1f   : > { %v326_v0 = vld [vmem:[%s2142_s22] sm:$0xff]  ;;  %v328_v1 = vld [vmem:[%s2142_s22 + $0x10] sm:$0xff] }
  0x20   : > { %v330_v2 = vld [vmem:[%s2142_s22 + $0x20] sm:$0xff]  ;;  %327 = vst [vmem:[%s264_s23] sm:$0xff] %v326_v0  ;;  %329 = vst [vmem:[%s264_s23 + $0x8] sm:$0xff] %v328_v1  ;;  %v332_v3 = vld [vmem:[%s2142_s22 + $0x30] sm:$0xff] }
  0x21   : > { %331 = vst [vmem:[%s264_s23 + $0x10] sm:$0xff] %v330_v2  ;;  %v334_v4 = vld [vmem:[%s2142_s22 + $0x40] sm:$0xff]  ;;  %v336_v5 = vld [vmem:[%s2142_s22 + $0x50] sm:$0xff]  ;;  %333 = vst [vmem:[%s264_s23 + $0x18] sm:$0xff] %v332_v3 }
  0x22   : > { %335 = vst [vmem:[%s264_s23 + $0x20] sm:$0xff] %v334_v4  ;;  %337 = vst [vmem:[%s264_s23 + $0x28] sm:$0xff] %v336_v5  ;;  %v338_v6 = vld [vmem:[%s2142_s22 + $0x60] sm:$0xff]  ;;  %v340_v7 = vld [vmem:[%s2142_s22 + $0x70] sm:$0xff] }
  0x23   : > { %v342_v8 = vld [vmem:[%s2142_s22 + $0x80] sm:$0xff]  ;;  %339 = vst [vmem:[%s264_s23 + $0x30] sm:$0xff] %v338_v6  ;;  %341 = vst [vmem:[%s264_s23 + $0x38] sm:$0xff] %v340_v7  ;;  %v344_v9 = vld [vmem:[%s2142_s22 + $0x90] sm:$0xff] }
  0x24   : > { %343 = vst [vmem:[%s264_s23 + $0x40] sm:$0xff] %v342_v8  ;;  %v346_v10 = vld [vmem:[%s2142_s22 + $0xa0] sm:$0xff]  ;;  %v348_v11 = vld [vmem:[%s2142_s22 + $0xb0] sm:$0xff]  ;;  %345 = vst [vmem:[%s264_s23 + $0x48] sm:$0xff] %v344_v9 }
  0x25   : > { %347 = vst [vmem:[%s264_s23 + $0x50] sm:$0xff] %v346_v10  ;;  %349 = vst [vmem:[%s264_s23 + $0x58] sm:$0xff] %v348_v11  ;;  %v350_v12 = vld [vmem:[%s2142_s22 + $0xc0] sm:$0xff]  ;;  %v352_v13 = vld [vmem:[%s2142_s22 + $0xd0] sm:$0xff] }
  0x26   : > { %v354_v14 = vld [vmem:[%s2142_s22 + $0xe0] sm:$0xff]  ;;  %351 = vst [vmem:[%s264_s23 + $0x60] sm:$0xff] %v350_v12  ;;  %353 = vst [vmem:[%s264_s23 + $0x68] sm:$0xff] %v352_v13  ;;  %v356_v15 = vld [vmem:[%s2142_s22 + $0xf0] sm:$0xff] }
  0x27   : > { %355 = vst [vmem:[%s264_s23 + $0x70] sm:$0xff] %v354_v14  ;;  %357 = vst [vmem:[%s264_s23 + $0x78] sm:$0xff] %v356_v15 }
  0x28 PF: > { %s372_s24 = sand.u32 1, %s2003_s26   ;;  %s1660_s9 = sshll.u32 %s2015_s29, 11 }
  0x29   : > { %s1609_s12 = sshll.u32 %s372_s24, 7  ;;  %s382_s18 = scalar_lea.hbm %s2669_s3, %s1660_s9 }
  0x2a   : > { %s376_s19 = scalar_lea.vmem [#allocation4], %s1609_s12  ;;  %s373_s21 = scalar_lea.sflag [#allocation5], %s372_s24 }
  0x2b   : > { %s383_s20 = sshll.u32 %s376_s19, 4  ;;  %s2025_s22 = smov [#allocation4]   ;;  %s384_s20 = int_to_ptr.vmem [resolvable:$true] %s383_s20 }
  0x2c   : > { %s1943_s1 = scalar_lea.vmem %s384_s20, 2048  ;;  %s1947_s23 = sshll.u32 %s2025_s22, 4  ;;  %s1948_s23 = int_to_ptr.vmem [resolvable:$false] %s1947_s23 }
  0x2d   : > { %p1944_p10 = scmp.ne.s32.totalorder %s384_s20, %s1943_s1  ;;  %s1949_s11 = scalar_lea.vmem %s1948_s23, 4096 }
  0x2e   : > { %p1950_p13 = scmp.lt.s32.totalorder %s384_s20, %s1948_s23  ;;  %p1951_p0 = scmp.lt.s32.totalorder %s1949_s11, %s1943_s1 }
  0x2f   : > { %p1945_p11 = pnand %p1944_p10, %p2120_p5 }
  0x30   : > { %p1952_p1 = por %p1951_p0, %p1950_p13 }
  0x31   : > { %p1946_p12 = pneg %p1945_p11 }
  0x33   : > { %p1953_p2 = pnand %p1952_p1, %p1946_p12 }
  0x35   : > { %1956 = shalt.err (!%p1953_p2)
}
  0x36   : > { %s2026_s13 = smov 64   ;;  %s2027_s9 = smov 4  }
  0x37   : > { %1725 = dma.hbm_to_vmem [thread:$0]  (%p2120_p5), %s382_s18, 2048, %s384_s20, %s373_s21, %s2026_s13, %s2026_s13, %s2027_s9  }
  0x38 PF: > { %p1612_p3 = scmp.ge.s32.totalorder %s2023_s8, 1  ;;  %p391_p4 = scmp.lt.s32.totalorder %s2023_s8, 5 }
  0x3a   : > { %p392_p6 = pnand %p1612_p3, %p391_p4 }
  0x3b   : > { %s398_s24 = sand.u32 (!%p392_p6), 1, %s1999_s25  }
  0x3c   : > { %395 = sbr.rel (%p392_p6) target bundleno = 947 (0x3b3), region = 82  ;;  %s1613_s12 = sshll.u32 (!%p392_p6), %s398_s24, 7 }
  0x3d   : > { %s2172_s1 = scalar_lea.vmem (!%p392_p6), [#allocation3], %s1613_s12  ;;  %s405_s11 = scalar_lea.sflag (!%p392_p6), [#allocation5], %s398_s24 }
  0x3e   : > { %s2174_s17 = scalar_lea.vmem (!%p392_p6), [#allocation4], %s1613_s12 }
  0x41   : > { %1990 = dma.done.wait (%p2130_p8), %s405_s11, 2048  }
  0x42   : > { %1992 = vsyncadd (%p2130_p8), %s405_s11, 4294965248  ;;  %s1615_s14 = sshll.u32 %s2011_s28, 4  ;;  %s1617_s18 = sshll.u32 %s2007_s27, 1 }
  0x43   : > { %p453_p5 = scmp.lt.s32.totalorder %s1615_s14, 31  ;;  %p460_p7 = scmp.lt.s32.totalorder %s1617_s18, 3 }
  0x44   : > { %p1620_p8 = scmp.ne.s32.totalorder %s2007_s27, 0 }
  0x45   : > { %s2694_s14 = smov (!%p453_p5, %s1615_s14), 31  ;;  %s2696_s18 = smov (!%p460_p7, %s1617_s18), 3 }
  0x46   : > { %s1616_s19 = sshll.u32 %s2694_s14, 3  ;;  %s462_s16 = scalar_lea.vmem %s2668_s2, %s2696_s18 }
  0x47   : > { %s2187_s22 = scalar_lea.vmem %s2666_s0, %s1616_s19  ;;  %s2196_s28 = scalar_lea.vmem %s2673_s7, %s1616_s19 }
  0x48   : > { %475 = sbr.rel (%p1620_p8) target bundleno = 86 (0x56), region = 94 }
  0x4d   : > { %v2028_v16 = vmov 0.0  }
  0x4e   : > { %476 = vst [vmem:[#allocation2 + $0x30] sm:$0xff] %v2028_v16  ;;  %477 = vst [vmem:[#allocation2] sm:$0xff] %v2028_v16 }
  0x4f   : > { %478 = vst [vmem:[#allocation2 + $0x58] sm:$0xff] %v2028_v16  ;;  %479 = vst [vmem:[#allocation2 + $0x18] sm:$0xff] %v2028_v16 }
  0x50   : > { %480 = vst [vmem:[#allocation2 + $0x50] sm:$0xff] %v2028_v16  ;;  %481 = vst [vmem:[#allocation2 + $0x68] sm:$0xff] %v2028_v16 }
  0x51   : > { %482 = vst [vmem:[#allocation2 + $0x8] sm:$0xff] %v2028_v16  ;;  %483 = vst [vmem:[#allocation2 + $0x48] sm:$0xff] %v2028_v16 }
  0x52   : > { %484 = vst [vmem:[#allocation2 + $0x40] sm:$0xff] %v2028_v16  ;;  %485 = vst [vmem:[#allocation2 + $0x20] sm:$0xff] %v2028_v16 }
  0x53   : > { %486 = vst [vmem:[#allocation2 + $0x10] sm:$0xff] %v2028_v16  ;;  %487 = vst [vmem:[#allocation2 + $0x38] sm:$0xff] %v2028_v16 }
  0x54   : > { %488 = vst [vmem:[#allocation2 + $0x60] sm:$0xff] %v2028_v16  ;;  %489 = vst [vmem:[#allocation2 + $0x70] sm:$0xff] %v2028_v16 }
  0x55   : > { %490 = vst [vmem:[#allocation2 + $0x78] sm:$0xff] %v2028_v16  ;;  %491 = vst [vmem:[#allocation2 + $0x28] sm:$0xff] %v2028_v16 }
  0x56 PF: > { %v1795_v17 = vld [vmem:[%s2172_s1 + $0x74] ss:$8 sps:$4 sm:$0xff]   ;;  %v1797_v18 = vld [vmem:[%s2172_s1 + $0x70] ss:$8 sps:$4 sm:$0xff]   ;;  %v2029_v19 = vmov 0   ;;  %v2217_v34 = vld [vmem:[%s2187_s22] sm:$0xff]  ;;  %v534_v10 = vlaneseq }
  0x57   : > { %656 = vmatprep.mubr.bf16.mxu0 %v2029_v19  ;;  %624 = vmatprep.subr.bf16.mxu0 %v1795_v17  ;;  %v1798_v20 = vld [vmem:[%s2172_s1 + $0x64] ss:$8 sps:$4 sm:$0xff]   ;;  %v1800_v21 = vld [vmem:[%s2172_s1 + $0x60] ss:$8 sps:$4 sm:$0xff]   ;;  %v1801_v22 = vld [vmem:[%s2172_s1 + $0x54] ss:$8 sps:$4 sm:$0xff]  }
  0x58   : > { %625 = vmatpush1.bf16.msra.mxu0 %v1797_v18  ;;  %v1803_v23 = vld [vmem:[%s2172_s1 + $0x50] ss:$8 sps:$4 sm:$0xff]   ;;  %v1804_v24 = vld [vmem:[%s2172_s1 + $0x44] ss:$8 sps:$4 sm:$0xff]   ;;  %v1806_v25 = vld [vmem:[%s2172_s1 + $0x40] ss:$8 sps:$4 sm:$0xff]  }
  0x59   : > { %626 = vmatprep.subr.bf16.mxu0 %v1798_v20  ;;  %v1807_v26 = vld [vmem:[%s2172_s1 + $0x34] ss:$8 sps:$4 sm:$0xff]   ;;  %v1809_v27 = vld [vmem:[%s2172_s1 + $0x30] ss:$8 sps:$4 sm:$0xff]   ;;  %v1810_v28 = vld [vmem:[%s2172_s1 + $0x24] ss:$8 sps:$4 sm:$0xff]  }
  0x5a   : > { %v1812_v29 = vld [vmem:[%s2172_s1 + $0x20] ss:$8 sps:$4 sm:$0xff]   ;;  %v1813_v30 = vld [vmem:[%s2172_s1 + $0x14] ss:$8 sps:$4 sm:$0xff]   ;;  %v1815_v31 = vld [vmem:[%s2172_s1 + $0x10] ss:$8 sps:$4 sm:$0xff]  }
  0x5b   : > { %v1816_v32 = vld [vmem:[%s2172_s1 + $0x4] ss:$8 sps:$4 sm:$0xff]   ;;  %v1818_v33 = vld [vmem:[%s2172_s1] ss:$8 sps:$4 sm:$0xff]   ;;  %v2226_v37 = vld [vmem:[%s2187_s22 + $0x10] sm:$0xff]  ;;  %v535_v11 = vshrl.u32 %v534_v10, 7 }
  0x5c   : > { %627 = vmatpush1.bf16.msra.mxu0 %v1800_v21  ;;  %v2220_v35 = vld [vmem:[%s2187_s22 + $0x8] sm:$0xff]  ;;  %v2229_v38 = vld [vmem:[%s2187_s22 + $0x18] sm:$0xff]  ;;  %v2235_v40 = vld [vmem:[%s2187_s22 + $0x20] sm:$0xff]  ;;  %p1653_p9 = scmp.ne.s32.totalorder %s2007_s27, 1 }
  0x5d   : > { %628 = vmatprep.subr.bf16.mxu0 %v1801_v22  ;;  %v508_v36 = vpack.c.bf16 %v2220_v35, %v2217_v34  ;;  %v509_v39 = vpack.c.bf16 %v2229_v38, %v2226_v37  ;;  %v2238_v41 = vld [vmem:[%s2187_s22 + $0x28] sm:$0xff]  ;;  %v2244_v43 = vld [vmem:[%s2187_s22 + $0x30] sm:$0xff]  ;;  %v2247_v44 = vld [vmem:[%s2187_s22 + $0x38] sm:$0xff]  ;;  %v536_v12 = vsub.s32 0, %v535_v11  ;;  %v540_v14 = vsub.s32 1, %v535_v11 }
  0x5e   : > { %v510_v42 = vpack.c.bf16 %v2238_v41, %v2235_v40  ;;  %v511_v45 = vpack.c.bf16 %v2247_v44, %v2244_v43  ;;  %v2253_v46 = vld [vmem:[%s2187_s22 + $0x40] sm:$0xff]  ;;  %v2256_v47 = vld [vmem:[%s2187_s22 + $0x48] sm:$0xff]  ;;  %v2262_v49 = vld [vmem:[%s2187_s22 + $0x50] sm:$0xff] }
  0x5f   : > { %v512_v48 = vpack.c.bf16 %v2256_v47, %v2253_v46  ;;  %v2265_v50 = vld [vmem:[%s2187_s22 + $0x58] sm:$0xff]  ;;  %v2271_v52 = vld [vmem:[%s2187_s22 + $0x60] sm:$0xff]  ;;  %v2274_v53 = vld [vmem:[%s2187_s22 + $0x68] sm:$0xff] }
  0x60   : > { %629 = vmatpush1.bf16.msra.mxu0 %v1803_v23  ;;  %v513_v51 = vpack.c.bf16 %v2265_v50, %v2262_v49  ;;  %v514_v54 = vpack.c.bf16 %v2274_v53, %v2271_v52  ;;  %v2280_v55 = vld [vmem:[%s2187_s22 + $0x70] sm:$0xff]  ;;  %v2283_v56 = vld [vmem:[%s2187_s22 + $0x78] sm:$0xff]  ;;  %v1823_v62 = vld [vmem:[%s2174_s17 + $0x68] sm:$0xff]  }
  0x61   : > { %630 = vmatprep.subr.bf16.mxu0 %v1804_v24  ;;  %v515_v57 = vpack.c.bf16 %v2283_v56, %v2280_v55  ;;  %v1819_v58 = vld [vmem:[%s2174_s17 + $0x78] sm:$0xff]   ;;  %v1821_v60 = vld [vmem:[%s2174_s17 + $0x70] sm:$0xff]   ;;  %v1824_v63 = vld [vmem:[%s2174_s17 + $0x28] sm:$0xff]  }
  0x62   : > { %v1820_v59 = vld [vmem:[%s2174_s17 + $0x38] sm:$0xff]   ;;  %1661 = vmatprep.subr.bf16.mxu1 %v1819_v58  ;;  %v1822_v61 = vld [vmem:[%s2174_s17 + $0x30] sm:$0xff]   ;;  %v1825_v0 = vld [vmem:[%s2174_s17 + $0x60] sm:$0xff]  }
  0x63   : > { %1662 = vmatpush3.bf16.msra.mxu1 %v1820_v59  ;;  %v1826_v1 = vld [vmem:[%s2174_s17 + $0x20] sm:$0xff]   ;;  %v1827_v2 = vld [vmem:[%s2174_s17 + $0x58] sm:$0xff]   ;;  %v1829_v4 = vld [vmem:[%s2174_s17 + $0x50] sm:$0xff]  }
  0x64   : > { %631 = vmatpush1.bf16.msra.mxu0 %v1806_v25  ;;  %1663 = vmatprep.subr.bf16.mxu1 %v1821_v60  ;;  %v1828_v3 = vld [vmem:[%s2174_s17 + $0x18] sm:$0xff]   ;;  %v1830_v5 = vld [vmem:[%s2174_s17 + $0x10] sm:$0xff]   ;;  %v1831_v6 = vld [vmem:[%s2174_s17 + $0x48] sm:$0xff]  }
  0x65   : > { %632 = vmatprep.subr.bf16.mxu0 %v1807_v26  ;;  %v1832_v7 = vld [vmem:[%s2174_s17 + $0x8] sm:$0xff]   ;;  %v1833_v8 = vld [vmem:[%s2174_s17 + $0x40] sm:$0xff]  }
  0x66   : > { %v1834_v9 = vld [vmem:[%s2174_s17] sm:$0xff]  }
  0x67   : > { %1664 = vmatpush3.bf16.msra.mxu1 %v1822_v61  ;;  %v532_v13 = vld [vmem:[%s462_s16] sm:$0x3] }
  0x68   : > { %633 = vmatpush1.bf16.msra.mxu0 %v1809_v27  ;;  %1665 = vmatprep.subr.bf16.mxu1 %v1823_v62  ;;  %v2308_v15 = vrot.slane %v532_v13, %v536_v12  ;;  %v2310_v16 = vrot.slane %v532_v13, %v540_v14 }
  0x69   : > { %634 = vmatprep.subr.bf16.mxu0 %v1810_v28 }
  0x6b   : > { %1666 = vmatpush3.bf16.msra.mxu1 %v1824_v63 }
  0x6c   : > { %635 = vmatpush1.bf16.msra.mxu0 %v1812_v29  ;;  %1667 = vmatprep.subr.bf16.mxu1 %v1825_v0 }
  0x6d   : > { %636 = vmatprep.subr.bf16.mxu0 %v1813_v30 }
  0x6f   : > { %1668 = vmatpush3.bf16.msra.mxu1 %v1826_v1 }
  0x70   : > { %637 = vmatpush1.bf16.msra.mxu0 %v1815_v31  ;;  %1669 = vmatprep.subr.bf16.mxu1 %v1827_v2 }
  0x71   : > { %638 = vmatprep.subr.bf16.mxu0 %v1816_v32 }
  0x73   : > { %1670 = vmatpush3.bf16.msra.mxu1 %v1828_v3 }
  0x74   : > { %639 = vmatpush1.bf16.msra.mxu0 %v1818_v33  ;;  %1671 = vmatprep.subr.bf16.mxu1 %v1829_v4 }
  0x77   : > { %657 = vmatmul.mubr.bf16.vlgmr.msra.gmra.mxu0 %v508_v36  ;;  %1672 = vmatpush3.bf16.msra.mxu1 %v1830_v5 }
  0x78   : > { %666 = vmatprep.mubr.bf16.mxu0 %v2029_v19  ;;  %1673 = vmatprep.subr.bf16.mxu1 %v1831_v6 }
  0x7b   : > { %1674 = vmatpush3.bf16.msra.mxu1 %v1832_v7 }
  0x7c   : > { %1675 = vmatprep.subr.bf16.mxu1 %v1833_v8 }
  0x7f   : > { %667 = vmatmul.mubr.bf16.gmra.mxu0 %v509_v39  ;;  %1676 = vmatpush3.bf16.msra.mxu1 %v1834_v9 }
  0x80   : > { %676 = vmatprep.mubr.bf16.mxu0 %v2029_v19 }
  0x87   : > { %677 = vmatmul.mubr.bf16.gmra.mxu0 %v510_v42 }
  0x88   : > { %686 = vmatprep.mubr.bf16.mxu0 %v2029_v19 }
  0x8f   : > { %687 = vmatmul.mubr.bf16.gmra.mxu0 %v511_v45 }
  0x90   : > { %696 = vmatprep.mubr.bf16.mxu0 %v2029_v19 }
  0x97   : > { %697 = vmatmul.mubr.bf16.gmra.mxu0 %v512_v48 }
  0x98   : > { %706 = vmatprep.mubr.bf16.mxu0 %v2029_v19 }
  0x9f   : > { %707 = vmatmul.mubr.bf16.gmra.mxu0 %v513_v51 }
  0xa0   : > { %716 = vmatprep.mubr.bf16.mxu0 %v2029_v19 }
  0xa7   : > { %717 = vmatmul.mubr.bf16.gmra.mxu0 %v514_v54 }
  0xa8   : > { %726 = vmatprep.mubr.bf16.mxu0 %v2029_v19 }
  0xaf   : > { %727 = vmatmul.mubr.bf16.gmra.mxu0 %v515_v57 }
 0x137   : > { %v658_v17 = vpop.f32.mrf.mxu0 }
 0x138   : > { %v659_v18 = vadd.f32 %v658_v17, %v2308_v15 }
 0x139   : > { %v660_v19 = vpop.f32.mrf.mxu0 }
 0x13a   : > { %v769_v20 = vmul.f32 0.70710677, %v659_v18  ;;  %v661_v21 = vadd.f32 %v660_v19, %v2310_v16 }
 0x13b   : > { %v662_v22 = vpop.f32.mrf.mxu0 }
 0x13c   : > { %v770_v23 = vmul.f32 0.70710677, %v661_v21  ;;  %v663_v24 = vadd.f32 %v662_v22, %v2308_v15  ;;  %1835 = verf.f32 %v769_v20  ;;  %v738_v14 = vmul.f32 0.5, %v661_v21 }
 0x13d   : > { %v664_v25 = vpop.f32.mrf.mxu0 }
 0x13e   : > { %v771_v26 = vmul.f32 0.70710677, %v663_v24  ;;  %v665_v27 = vadd.f32 %v664_v25, %v2310_v16  ;;  %1837 = verf.f32 %v770_v23  ;;  %v739_v12 = vmul.f32 0.5, %v663_v24 }
 0x13f   : > { %v668_v28 = vpop.f32.mrf.mxu0  ;;  %v737_v23 = vmul.f32 0.5, %v659_v18 }
 0x140   : > { %1839 = verf.f32 %v771_v26  ;;  %v772_v29 = vmul.f32 0.70710677, %v665_v27  ;;  %v2317_v30 = vadd.f32 %v668_v28, %v2308_v15  ;;  %v740_v17 = vmul.f32 0.5, %v665_v27 }
 0x141   : > { %v670_v31 = vpop.f32.mrf.mxu0 }
 0x142   : > { %1841 = verf.f32 %v772_v29  ;;  %v773_v32 = vmul.f32 0.70710677, %v2317_v30  ;;  %v2321_v33 = vadd.f32 %v670_v31, %v2310_v16 }
 0x143   : > { %v672_v36 = vpop.f32.mrf.mxu0 }
 0x144   : > { %v774_v39 = vmul.f32 0.70710677, %v2321_v33  ;;  %v673_v42 = vadd.f32 %v672_v36, %v2308_v15  ;;  %1843 = verf.f32 %v773_v32 }
 0x145   : > { %v674_v45 = vpop.f32.mrf.mxu0 }
 0x146   : > { %v775_v48 = vmul.f32 0.70710677, %v673_v42  ;;  %v675_v51 = vadd.f32 %v674_v45, %v2310_v16  ;;  %1845 = verf.f32 %v774_v39 }
 0x147   : > { %v678_v54 = vpop.f32.mrf.mxu0 }
 0x148   : > { %1847 = verf.f32 %v775_v48  ;;  %v776_v57 = vmul.f32 0.70710677, %v675_v51  ;;  %v2327_v58 = vadd.f32 %v678_v54, %v2308_v15 }
 0x149   : > { %v680_v59 = vpop.f32.mrf.mxu0  ;;  %v1836_v61 = vpop.eup %1835 }
 0x14a   : > { %1849 = verf.f32 %v776_v57  ;;  %v777_v60 = vmul.f32 0.70710677, %v2327_v58  ;;  %v2331_v62 = vadd.f32 %v680_v59, %v2310_v16  ;;  %v833_v11 = vadd.f32 1.0, %v1836_v61 }
 0x14b   : > { %v682_v63 = vpop.f32.mrf.mxu0  ;;  %v1838_v0 = vpop.eup %1837 }
 0x14c   : > { %v2334_v1 = vadd.f32 %v682_v63, %v2308_v15  ;;  %v778_v3 = vmul.f32 0.70710677, %v2331_v62  ;;  %1851 = verf.f32 %v777_v60  ;;  %v834_v10 = vadd.f32 1.0, %v1838_v0 }
 0x14d   : > { %v1840_v2 = vpop.eup %1839  ;;  %v684_v4 = vpop.f32.mrf.mxu0  ;;  %v865_v21 = vmul.f32 %v833_v11, %v737_v23  ;;  %v743_v63 = vmul.f32 0.5, %v673_v42 }
 0x14e   : > { %v835_v5 = vadd.f32 1.0, %v1840_v2  ;;  %v779_v6 = vmul.f32 0.70710677, %v2334_v1  ;;  %v2339_v7 = vadd.f32 %v684_v4, %v2310_v16  ;;  %1853 = verf.f32 %v778_v3 }
 0x14f   : > { %v1842_v8 = vpop.eup %1841  ;;  %v688_v9 = vpop.f32.mrf.mxu0  ;;  %v866_v31 = vmul.f32 %v834_v10, %v738_v14  ;;  %v744_v4 = vmul.f32 0.5, %v675_v51 }
 0x150   : > { %1855 = verf.f32 %v779_v6  ;;  %v780_v13 = vmul.f32 0.70710677, %v2339_v7  ;;  %v2343_v19 = vadd.f32 %v688_v9, %v2308_v15  ;;  %v836_v22 = vadd.f32 1.0, %v1842_v8 }
 0x151   : > { %v690_v20 = vpop.f32.mrf.mxu0  ;;  %v867_v25 = vmul.f32 %v835_v5, %v739_v12  ;;  %v1844_v28 = vpop.eup %1843  ;;  %v741_v8 = vmul.f32 0.5, %v2317_v30  ;;  %v742_v9 = vmul.f32 0.5, %v2321_v33 }
 0x152   : > { %1857 = verf.f32 %v780_v13  ;;  %v2346_v26 = vadd.f32 %v690_v20, %v2310_v16  ;;  %v781_v29 = vmul.f32 0.70710677, %v2343_v19  ;;  %v868_v32 = vmul.f32 %v836_v22, %v740_v17 }
 0x153   : > { %v692_v24 = vpop.f32.mrf.mxu0  ;;  %v1846_v36 = vpop.eup %1845  ;;  %v913_v59 = vpack.c.bf16 %v867_v25, %v865_v21  ;;  %v837_v3 = vadd.f32 1.0, %v1844_v28  ;;  %v747_v28 = vmul.f32 0.5, %v2334_v1 }
 0x154   : > { %v782_v27 = vmul.f32 0.70710677, %v2346_v26  ;;  %v2351_v45 = vadd.f32 %v692_v24, %v2308_v15  ;;  %v914_v48 = vpack.c.bf16 %v868_v32, %v866_v31  ;;  %v838_v61 = vadd.f32 1.0, %v1846_v36 }
 0x155   : > { %v1848_v39 = vpop.eup %1847  ;;  %v694_v18 = vpop.f32.mrf.mxu0  ;;  %v869_v30 = vmul.f32 %v837_v3, %v741_v8 }
 0x156   : > { %v839_v54 = vadd.f32 1.0, %v1848_v39  ;;  %1859 = verf.f32 %v782_v27  ;;  %v2354_v57 = vadd.f32 %v694_v18, %v2310_v16  ;;  %v783_v0 = vmul.f32 0.70710677, %v2351_v45  ;;  %1089 = vmatprep.mubr.bf16.mxu1 %v914_v48 }
 0x157   : > { %v1850_v60 = vpop.eup %1849  ;;  %1861 = verf.f32 %v781_v29  ;;  %v698_v2 = vpop.f32.mrf.mxu0  ;;  %1090 = vmatmul.mubr.bf16.vlgmr.msra.gmra.mxu1 %v913_v59  ;;  %v870_v14 = vmul.f32 %v838_v61, %v742_v9  ;;  %v748_v39 = vmul.f32 0.5, %v2339_v7  ;;  %v745_v7 = vmul.f32 0.5, %v2327_v58 }
 0x158   : > { %v840_v5 = vadd.f32 1.0, %v1850_v60  ;;  %v784_v6 = vmul.f32 0.70710677, %v2354_v57  ;;  %1863 = verf.f32 %v783_v0  ;;  %v2361_v10 = vadd.f32 %v698_v2, %v2308_v15 }
 0x159   : > { %v700_v42 = vpop.f32.mrf.mxu0  ;;  %v871_v11 = vmul.f32 %v839_v54, %v743_v63  ;;  %v1852_v51 = vpop.eup %1851  ;;  %v746_v60 = vmul.f32 0.5, %v2331_v62 }
 0x15a   : > { %v872_v12 = vmul.f32 %v840_v5, %v744_v4  ;;  %1865 = verf.f32 %v784_v6  ;;  %v2364_v13 = vadd.f32 %v700_v42, %v2310_v16  ;;  %v785_v17 = vmul.f32 0.70710677, %v2361_v10 }
 0x15b   : > { %v702_v20 = vpop.f32.mrf.mxu0  ;;  %v1854_v22 = vpop.eup %1853  ;;  %v915_v36 = vpack.c.bf16 %v871_v11, %v869_v30  ;;  %v841_v54 = vadd.f32 1.0, %v1852_v51  ;;  %v750_v11 = vmul.f32 0.5, %v2346_v26 }
 0x15c   : > { %v786_v33 = vmul.f32 0.70710677, %v2364_v13  ;;  %v2369_v23 = vadd.f32 %v702_v20, %v2308_v15  ;;  %v916_v24 = vpack.c.bf16 %v872_v12, %v870_v14  ;;  %1867 = verf.f32 %v785_v17 }
 0x15d   : > { %v1856_v25 = vpop.eup %1855  ;;  %v704_v29 = vpop.f32.mrf.mxu0  ;;  %v842_v27 = vadd.f32 1.0, %v1854_v22  ;;  %v873_v9 = vmul.f32 %v841_v54, %v745_v7  ;;  %v751_v20 = vmul.f32 0.5, %v2351_v45 }
 0x15e   : > { %v843_v31 = vadd.f32 1.0, %v1856_v25  ;;  %v787_v32 = vmul.f32 0.70710677, %v2369_v23  ;;  %1869 = verf.f32 %v786_v33  ;;  %v2375_v18 = vadd.f32 %v704_v29, %v2310_v16  ;;  %1097 = vmatprep.mubr.bf16.mxu1 %v916_v24 }
 0x15f   : > { %v1858_v21 = vpop.eup %1857  ;;  %v708_v48 = vpop.f32.mrf.mxu0  ;;  %1098 = vmatmul.mubr.bf16.gmra.mxu1 %v915_v36  ;;  %v874_v5 = vmul.f32 %v842_v27, %v746_v60  ;;  %v752_v29 = vmul.f32 0.5, %v2354_v57  ;;  %v749_v36 = vmul.f32 0.5, %v2343_v19 }
 0x160   : > { %v844_v59 = vadd.f32 1.0, %v1858_v21  ;;  %1871 = verf.f32 %v787_v32  ;;  %v2378_v1 = vadd.f32 %v708_v48, %v2308_v15  ;;  %v788_v61 = vmul.f32 0.70710677, %v2375_v18 }
 0x161   : > { %v710_v63 = vpop.f32.mrf.mxu0  ;;  %v875_v0 = vmul.f32 %v843_v31, %v747_v28 }
 0x162   : > { %v876_v2 = vmul.f32 %v844_v59, %v748_v39  ;;  %v2384_v3 = vadd.f32 %v710_v63, %v2310_v16  ;;  %1873 = verf.f32 %v788_v61  ;;  %v789_v42 = vmul.f32 0.70710677, %v2378_v1 }
 0x163   : > { %v1860_v4 = vpop.eup %1859  ;;  %v712_v6 = vpop.f32.mrf.mxu0  ;;  %v917_v30 = vpack.c.bf16 %v875_v0, %v873_v9 }
 0x164   : > { %v1862_v8 = vpop.eup %1861  ;;  %v790_v62 = vmul.f32 0.70710677, %v2384_v3  ;;  %v846_v12 = vadd.f32 1.0, %v1860_v4  ;;  %v2390_v58 = vadd.f32 %v712_v6, %v2308_v15  ;;  %v918_v14 = vpack.c.bf16 %v876_v2, %v874_v5 }
 0x165   : > { %v714_v51 = vpop.f32.mrf.mxu0  ;;  %v1864_v17 = vpop.eup %1863  ;;  %v845_v25 = vadd.f32 1.0, %v1862_v8 }
 0x166   : > { %1875 = verf.f32 %v790_v62  ;;  %v2394_v22 = vadd.f32 %v714_v51, %v2310_v16  ;;  %v847_v28 = vadd.f32 1.0, %v1864_v17  ;;  %v791_v26 = vmul.f32 0.70710677, %v2390_v58  ;;  %1105 = vmatprep.mubr.bf16.mxu1 %v918_v14 }
 0x167   : > { %v1866_v33 = vpop.eup %1865  ;;  %v718_v24 = vpop.f32.mrf.mxu0  ;;  %1877 = verf.f32 %v789_v42  ;;  %1106 = vmatmul.mubr.bf16.gmra.mxu1 %v917_v30  ;;  %v878_v21 = vmul.f32 %v846_v12, %v750_v11  ;;  %v877_v63 = vmul.f32 %v845_v25, %v749_v36  ;;  %v755_v51 = vmul.f32 0.5, %v2369_v23 }
 0x168   : > { %v848_v31 = vadd.f32 1.0, %v1866_v33  ;;  %v792_v32 = vmul.f32 0.70710677, %v2394_v22  ;;  %v2400_v45 = vadd.f32 %v718_v24, %v2308_v15  ;;  %1879 = verf.f32 %v791_v26 }
 0x169   : > { %v720_v27 = vpop.f32.mrf.mxu0  ;;  %v879_v39 = vmul.f32 %v847_v28, %v751_v20  ;;  %v1868_v54 = vpop.eup %1867  ;;  %v754_v17 = vmul.f32 0.5, %v2364_v13  ;;  %v756_v20 = vmul.f32 0.5, %v2375_v18  ;;  %v753_v28 = vmul.f32 0.5, %v2361_v10 }
 0x16a   : > { %v880_v48 = vmul.f32 %v848_v31, %v752_v29  ;;  %1881 = verf.f32 %v792_v32  ;;  %v793_v57 = vmul.f32 0.70710677, %v2400_v45  ;;  %v2405_v59 = vadd.f32 %v720_v27, %v2310_v16 }
 0x16b   : > { %v722_v60 = vpop.f32.mrf.mxu0  ;;  %v1870_v61 = vpop.eup %1869  ;;  %v919_v8 = vpack.c.bf16 %v879_v39, %v877_v63  ;;  %v849_v12 = vadd.f32 1.0, %v1868_v54  ;;  %v758_v18 = vmul.f32 0.5, %v2384_v3 }
 0x16c   : > { %v2408_v7 = vadd.f32 %v722_v60, %v2308_v15  ;;  %v920_v0 = vpack.c.bf16 %v880_v48, %v878_v21  ;;  %v794_v2 = vmul.f32 0.70710677, %v2405_v59  ;;  %1883 = verf.f32 %v793_v57 }
 0x16d   : > { %v1872_v19 = vpop.eup %1871  ;;  %v724_v4 = vpop.f32.mrf.mxu0  ;;  %v850_v9 = vadd.f32 1.0, %v1870_v61  ;;  %v881_v36 = vmul.f32 %v849_v12, %v753_v28  ;;  %v759_v60 = vmul.f32 0.5, %v2390_v58 }
 0x16e   : > { %v851_v5 = vadd.f32 1.0, %v1872_v19  ;;  %v795_v6 = vmul.f32 0.70710677, %v2408_v7  ;;  %1113 = vmatprep.mubr.bf16.mxu1 %v920_v0  ;;  %1885 = verf.f32 %v794_v2  ;;  %v2413_v42 = vadd.f32 %v724_v4, %v2310_v16 }
 0x16f   : > { %v728_v62 = vpop.f32.mrf.mxu0  ;;  %v1874_v11 = vpop.eup %1873  ;;  %1114 = vmatmul.mubr.bf16.gmra.mxu1 %v919_v8  ;;  %v882_v24 = vmul.f32 %v850_v9, %v754_v17  ;;  %v760_v2 = vmul.f32 0.5, %v2394_v22 }
 0x170   : > { %1887 = verf.f32 %v795_v6  ;;  %v2417_v14 = vadd.f32 %v728_v62, %v2308_v15  ;;  %v852_v30 = vadd.f32 1.0, %v1874_v11  ;;  %v796_v33 = vmul.f32 0.70710677, %v2413_v42 }
 0x171   : > { %v730_v25 = vpop.f32.mrf.mxu0  ;;  %v883_v29 = vmul.f32 %v851_v5, %v755_v51  ;;  %v757_v6 = vmul.f32 0.5, %v2378_v1  ;;  %v762_v1 = vmul.f32 0.5, %v2405_v59  ;;  %v764_v28 = vmul.f32 0.5, %v2413_v42 }
 0x172   : > { %v2424_v26 = vadd.f32 %v730_v25, %v2310_v16  ;;  %v884_v31 = vmul.f32 %v852_v30, %v756_v20  ;;  %1889 = verf.f32 %v796_v33  ;;  %v797_v13 = vmul.f32 0.70710677, %v2417_v14 }
 0x173   : > { %v1876_v23 = vpop.eup %1875  ;;  %v732_v32 = vpop.f32.mrf.mxu0  ;;  %v921_v63 = vpack.c.bf16 %v883_v29, %v881_v36  ;;  %v763_v25 = vmul.f32 0.5, %v2408_v7 }
 0x174   : > { %v1878_v21 = vpop.eup %1877  ;;  %v798_v27 = vmul.f32 0.70710677, %v2424_v26  ;;  %v733_v39 = vadd.f32 %v732_v32, %v2308_v15  ;;  %v922_v48 = vpack.c.bf16 %v884_v31, %v882_v24  ;;  %v854_v54 = vadd.f32 1.0, %v1876_v23 }
 0x175   : > { %v734_v10 = vpop.f32.mrf.mxu0  ;;  %v1880_v57 = vpop.eup %1879  ;;  %v853_v3 = vadd.f32 1.0, %v1878_v21  ;;  %v761_v23 = vmul.f32 0.5, %v2400_v45  ;;  %v766_v7 = vmul.f32 0.5, %v2424_v26  ;;  %v765_v45 = vmul.f32 0.5, %v2417_v14 }
 0x176   : > { %v735_v61 = vadd.f32 %v734_v10, %v2310_v16  ;;  %v855_v19 = vadd.f32 1.0, %v1880_v57  ;;  %1891 = verf.f32 %v798_v27  ;;  %v799_v4 = vmul.f32 0.70710677, %v733_v39  ;;  %1121 = vmatprep.mubr.bf16.mxu1 %v922_v48 }
 0x177   : > { %v1882_v0 = vpop.eup %1881  ;;  %1893 = verf.f32 %v797_v13  ;;  %1122 = vmatmul.mubr.bf16.gmra.mxu1 %v921_v63  ;;  %v886_v8 = vmul.f32 %v854_v54, %v758_v18  ;;  %v885_v11 = vmul.f32 %v853_v3, %v757_v6  ;;  %v767_v42 = vmul.f32 0.5, %v733_v39  ;;  %v897_v6 = vld [vmem:[#allocation2 + $0x30] sm:$0xff]  ;;  %v898_v39 = vld [vmem:[#allocation2] sm:$0xff] }
 0x178   : > { %v856_v5 = vadd.f32 1.0, %v1882_v0  ;;  %v800_v15 = vmul.f32 0.70710677, %v735_v61  ;;  %1895 = verf.f32 %v799_v4  ;;  %v887_v58 = vmul.f32 %v855_v19, %v759_v60 }
 0x179   : > { %v1884_v16 = vpop.eup %1883  ;;  %v768_v60 = vmul.f32 0.5, %v735_v61 }
 0x17a   : > { %v888_v9 = vmul.f32 %v856_v5, %v760_v2  ;;  %1897 = verf.f32 %v800_v15  ;;  %v923_v17 = vpack.c.bf16 %v887_v58, %v885_v11  ;;  %v857_v33 = vadd.f32 1.0, %v1884_v16  ;;  %v899_v11 = vld [vmem:[#allocation2 + $0x58] sm:$0xff] }
 0x17b   : > { %v1886_v62 = vpop.eup %1885 }
 0x17c   : > { %v924_v12 = vpack.c.bf16 %v888_v9, %v886_v8  ;;  %v858_v20 = vadd.f32 1.0, %v1886_v62  ;;  %v889_v13 = vmul.f32 %v857_v33, %v761_v23 }
 0x17d   : > { %v1888_v22 = vpop.eup %1887 }
 0x17e   : > { %v859_v51 = vadd.f32 1.0, %v1888_v22  ;;  %1129 = vmatprep.mubr.bf16.mxu1 %v924_v12  ;;  %v890_v31 = vmul.f32 %v858_v20, %v762_v1  ;;  %v900_v20 = vld [vmem:[#allocation2 + $0x18] sm:$0xff] }
 0x17f   : > { %v1890_v30 = vpop.eup %1889  ;;  %1130 = vmatmul.mubr.bf16.gmra.mxu1 %v923_v17 }
 0x180   : > { %v860_v29 = vadd.f32 1.0, %v1890_v30  ;;  %v891_v24 = vmul.f32 %v859_v51, %v763_v25 }
 0x182   : > { %v892_v32 = vmul.f32 %v860_v29, %v764_v28  ;;  %v925_v48 = vpack.c.bf16 %v891_v24, %v889_v13  ;;  %v901_v28 = vld [vmem:[#allocation2 + $0x50] sm:$0xff] }
 0x183   : > { %v1892_v36 = vpop.eup %1891 }
 0x184   : > { %v1894_v21 = vpop.eup %1893  ;;  %v926_v18 = vpack.c.bf16 %v892_v32, %v890_v31  ;;  %v862_v10 = vadd.f32 1.0, %v1892_v36  ;;  %v902_v32 = vld [vmem:[#allocation2 + $0x68] sm:$0xff] }
 0x185   : > { %v1896_v27 = vpop.eup %1895  ;;  %v861_v59 = vadd.f32 1.0, %v1894_v21 }
 0x186   : > { %v863_v54 = vadd.f32 1.0, %v1896_v27  ;;  %1137 = vmatprep.mubr.bf16.mxu1 %v926_v18  ;;  %v894_v0 = vmul.f32 %v862_v10, %v766_v7  ;;  %v903_v27 = vld [vmem:[#allocation2 + $0x8] sm:$0xff] }
 0x187   : > { %v1898_v57 = vpop.eup %1897  ;;  %1138 = vmatmul.mubr.bf16.gmra.mxu1 %v925_v48  ;;  %v893_v4 = vmul.f32 %v861_v59, %v765_v45  ;;  %v905_v45 = vld [vmem:[#allocation2 + $0x40] sm:$0xff] }
 0x188   : > { %v864_v63 = vadd.f32 1.0, %v1898_v57  ;;  %v895_v19 = vmul.f32 %v863_v54, %v767_v42  ;;  %v904_v54 = vld [vmem:[#allocation2 + $0x48] sm:$0xff] }
 0x18a   : > { %v896_v2 = vmul.f32 %v864_v63, %v768_v60  ;;  %v927_v5 = vpack.c.bf16 %v895_v19, %v893_v4 }
 0x18c   : > { %v928_v3 = vpack.c.bf16 %v896_v2, %v894_v0 }
 0x18e   : > { %1145 = vmatprep.mubr.bf16.mxu1 %v928_v3  ;;  %v906_v3 = vld [vmem:[#allocation2 + $0x20] sm:$0xff] }
 0x18f   : > { %1146 = vmatmul.mubr.bf16.gmra.mxu1 %v927_v5 }
 0x217   : > { %v1677_v15 = vpop.f32.mrf.mxu1 }
 0x219   : > { %v1678_v26 = vpop.f32.mrf.mxu1 }
 0x21a   : > { %v1679_v8 = vadd.f32 %v1678_v26, %v1677_v15 }
 0x21b   : > { %v1680_v58 = vpop.f32.mrf.mxu1 }
 0x21c   : > { %v1154_v9 = vadd.f32 %v1679_v8, %v897_v6  ;;  %v907_v8 = vld [vmem:[#allocation2 + $0x10] sm:$0xff] }
 0x21d   : > { %v1681_v61 = vpop.f32.mrf.mxu1 }
 0x21e   : > { %1170 = vst [vmem:[#allocation2 + $0x30] sm:$0xff] %v1154_v9  ;;  %v1682_v16 = vadd.f32 %v1681_v61, %v1680_v58 }
 0x21f   : > { %v1683_v62 = vpop.f32.mrf.mxu1 }
 0x220   : > { %v1155_v14 = vadd.f32 %v1682_v16, %v898_v39  ;;  %v908_v16 = vld [vmem:[#allocation2 + $0x38] sm:$0xff] }
 0x221   : > { %v1684_v12 = vpop.f32.mrf.mxu1 }
 0x222   : > { %1171 = vst [vmem:[#allocation2] sm:$0xff] %v1155_v14  ;;  %v1685_v22 = vadd.f32 %v1684_v12, %v1683_v62 }
 0x223   : > { %v1686_v51 = vpop.f32.mrf.mxu1 }
 0x224   : > { %v1156_v17 = vadd.f32 %v1685_v22, %v899_v11  ;;  %v909_v22 = vld [vmem:[#allocation2 + $0x60] sm:$0xff] }
 0x225   : > { %v1687_v30 = vpop.f32.mrf.mxu1 }
 0x226   : > { %1172 = vst [vmem:[#allocation2 + $0x58] sm:$0xff] %v1156_v17  ;;  %v1688_v33 = vadd.f32 %v1687_v30, %v1686_v51 }
 0x227   : > { %v1689_v25 = vpop.f32.mrf.mxu1 }
 0x228   : > { %v1157_v1 = vadd.f32 %v1688_v33, %v900_v20  ;;  %v910_v33 = vld [vmem:[#allocation2 + $0x70] sm:$0xff] }
 0x229   : > { %v1690_v29 = vpop.f32.mrf.mxu1 }
 0x22a   : > { %1173 = vst [vmem:[#allocation2 + $0x18] sm:$0xff] %v1157_v1  ;;  %v1691_v23 = vadd.f32 %v1690_v29, %v1689_v25 }
 0x22b   : > { %v1692_v24 = vpop.f32.mrf.mxu1 }
 0x22c   : > { %v1158_v31 = vadd.f32 %v1691_v23, %v901_v28  ;;  %v911_v23 = vld [vmem:[#allocation2 + $0x78] sm:$0xff] }
 0x22d   : > { %v1693_v36 = vpop.f32.mrf.mxu1 }
 0x22e   : > { %1174 = vst [vmem:[#allocation2 + $0x50] sm:$0xff] %v1158_v31  ;;  %v1694_v13 = vadd.f32 %v1693_v36, %v1692_v24 }
 0x22f   : > { %v1695_v21 = vpop.f32.mrf.mxu1 }
 0x230   : > { %v1159_v18 = vadd.f32 %v1694_v13, %v902_v32  ;;  %v912_v13 = vld [vmem:[#allocation2 + $0x28] sm:$0xff] }
 0x231   : > { %v1696_v10 = vpop.f32.mrf.mxu1 }
 0x232   : > { %1175 = vst [vmem:[#allocation2 + $0x68] sm:$0xff] %v1159_v18  ;;  %v1697_v48 = vadd.f32 %v1696_v10, %v1695_v21 }
 0x233   : > { %v1698_v57 = vpop.f32.mrf.mxu1 }
 0x234   : > { %v1160_v7 = vadd.f32 %v1697_v48, %v903_v27 }
 0x235   : > { %v1699_v59 = vpop.f32.mrf.mxu1 }
 0x236   : > { %1176 = vst [vmem:[#allocation2 + $0x8] sm:$0xff] %v1160_v7  ;;  %v1700_v42 = vadd.f32 %v1699_v59, %v1698_v57 }
 0x237   : > { %v1701_v60 = vpop.f32.mrf.mxu1 }
 0x238   : > { %v1161_v63 = vadd.f32 %v1700_v42, %v904_v54 }
 0x239   : > { %v1702_v0 = vpop.f32.mrf.mxu1 }
 0x23a   : > { %1177 = vst [vmem:[#allocation2 + $0x48] sm:$0xff] %v1161_v63  ;;  %v1703_v19 = vadd.f32 %v1702_v0, %v1701_v60 }
 0x23b   : > { %v1704_v2 = vpop.f32.mrf.mxu1 }
 0x23c   : > { %v1162_v4 = vadd.f32 %v1703_v19, %v905_v45 }
 0x23d   : > { %v1705_v5 = vpop.f32.mrf.mxu1 }
 0x23e   : > { %1178 = vst [vmem:[#allocation2 + $0x40] sm:$0xff] %v1162_v4  ;;  %v1706_v15 = vadd.f32 %v1705_v5, %v1704_v2 }
 0x23f   : > { %v1707_v6 = vpop.f32.mrf.mxu1 }
 0x240   : > { %v1163_v26 = vadd.f32 %v1706_v15, %v906_v3 }
 0x241   : > { %v1708_v58 = vpop.f32.mrf.mxu1 }
 0x242   : > { %1179 = vst [vmem:[#allocation2 + $0x20] sm:$0xff] %v1163_v26  ;;  %v1709_v9 = vadd.f32 %v1708_v58, %v1707_v6 }
 0x243   : > { %v1710_v39 = vpop.f32.mrf.mxu1 }
 0x244   : > { %v1164_v61 = vadd.f32 %v1709_v9, %v907_v8 }
 0x245   : > { %v1711_v62 = vpop.f32.mrf.mxu1 }
 0x246   : > { %1180 = vst [vmem:[#allocation2 + $0x10] sm:$0xff] %v1164_v61  ;;  %v1712_v14 = vadd.f32 %v1711_v62, %v1710_v39 }
 0x247   : > { %v1713_v11 = vpop.f32.mrf.mxu1 }
 0x248   : > { %v1165_v12 = vadd.f32 %v1712_v14, %v908_v16 }
 0x249   : > { %v1714_v51 = vpop.f32.mrf.mxu1 }
 0x24a   : > { %1181 = vst [vmem:[#allocation2 + $0x38] sm:$0xff] %v1165_v12  ;;  %v1715_v17 = vadd.f32 %v1714_v51, %v1713_v11 }
 0x24b   : > { %v1716_v20 = vpop.f32.mrf.mxu1 }
 0x24c   : > { %v1166_v30 = vadd.f32 %v1715_v17, %v909_v22 }
 0x24d   : > { %v1717_v25 = vpop.f32.mrf.mxu1 }
 0x24e   : > { %1182 = vst [vmem:[#allocation2 + $0x60] sm:$0xff] %v1166_v30  ;;  %v1718_v1 = vadd.f32 %v1717_v25, %v1716_v20 }
 0x24f   : > { %v1719_v28 = vpop.f32.mrf.mxu1 }
 0x250   : > { %v1167_v29 = vadd.f32 %v1718_v1, %v910_v33 }
 0x251   : > { %v1720_v24 = vpop.f32.mrf.mxu1 }
 0x252   : > { %1183 = vst [vmem:[#allocation2 + $0x70] sm:$0xff] %v1167_v29  ;;  %v1721_v31 = vadd.f32 %v1720_v24, %v1719_v28 }
 0x253   : > { %v1722_v32 = vpop.f32.mrf.mxu1 }
 0x254   : > { %v1168_v36 = vadd.f32 %v1721_v31, %v911_v23 }
 0x255   : > { %v1723_v21 = vpop.f32.mrf.mxu1 }
 0x256   : > { %1184 = vst [vmem:[#allocation2 + $0x78] sm:$0xff] %v1168_v36  ;;  %v1724_v18 = vadd.f32 %v1723_v21, %v1722_v32  ;;  %1189 = sbr.rel (%p1653_p9) target bundleno = 947 (0x3b3), region = 98 }
 0x258   : > { %v1169_v27 = vadd.f32 %v1724_v18, %v912_v13 }
 0x25a   : > { %1185 = vst [vmem:[#allocation2 + $0x28] sm:$0xff] %v1169_v27 }
 0x25b   : > { %v1190_v10 = vld [vmem:[#allocation2 + $0x30] sm:$0xff]  ;;  %v1654_v48 = vld [vmem:[%s2670_s4] ss:$0 sm:$0xff]  ;;  %v1192_v57 = vld [vmem:[#allocation2 + $0x58] sm:$0xff] }
 0x25c   : > { %v1213_v7 = vadd.f32 %v1654_v48, %v1190_v10  ;;  %v1215_v54 = vadd.f32 %v1654_v48, %v1192_v57  ;;  %v1191_v59 = vld [vmem:[#allocation2] sm:$0xff]  ;;  %v1193_v42 = vld [vmem:[#allocation2 + $0x18] sm:$0xff]  ;;  %v1194_v60 = vld [vmem:[#allocation2 + $0x50] sm:$0xff] }
 0x25d   : > { %v1214_v63 = vadd.f32 %v1654_v48, %v1191_v59  ;;  %v1216_v45 = vadd.f32 %v1654_v48, %v1193_v42  ;;  %v1195_v0 = vld [vmem:[#allocation2 + $0x68] sm:$0xff]  ;;  %v1217_v4 = vadd.f32 %v1654_v48, %v1194_v60  ;;  %v1199_v39 = vld [vmem:[#allocation2 + $0x20] sm:$0xff]  ;;  %v1200_v62 = vld [vmem:[#allocation2 + $0x10] sm:$0xff] }
 0x25e   : > { %v1229_v19 = vadd.f32 %v1213_v7, %v2217_v34  ;;  %v1231_v2 = vadd.f32 %v1215_v54, %v2226_v37  ;;  %v1218_v15 = vadd.f32 %v1654_v48, %v1195_v0  ;;  %v1196_v6 = vld [vmem:[#allocation2 + $0x8] sm:$0xff]  ;;  %v1198_v37 = vld [vmem:[#allocation2 + $0x40] sm:$0xff]  ;;  %v1222_v16 = vadd.f32 %v1654_v48, %v1199_v39  ;;  %v1201_v14 = vld [vmem:[#allocation2 + $0x38] sm:$0xff] }
 0x25f   : > { %v1230_v3 = vadd.f32 %v1214_v63, %v2220_v35  ;;  %v1232_v5 = vadd.f32 %v1216_v45, %v2229_v38  ;;  %v1197_v26 = vld [vmem:[#allocation2 + $0x48] sm:$0xff]  ;;  %v1219_v8 = vadd.f32 %v1654_v48, %v1196_v6  ;;  %v1233_v58 = vadd.f32 %v1217_v4, %v2235_v40  ;;  %v1202_v12 = vld [vmem:[#allocation2 + $0x60] sm:$0xff]  ;;  %v1203_v22 = vld [vmem:[#allocation2 + $0x70] sm:$0xff] }
 0x260   : > { %1245 = vadd.xlane.f32.xlu0 %v1229_v19  ;;  %1249 = vadd.xlane.f32.xlu1 %v1231_v2  ;;  %v2450_v9 = vadd.f32 %v1218_v15, %v2238_v41  ;;  %v1220_v34 = vadd.f32 %v1654_v48, %v1197_v26  ;;  %v1221_v38 = vadd.f32 %v1654_v48, %v1198_v37 }
 0x261   : > { %v2453_v61 = vadd.f32 %v1219_v8, %v2244_v43  ;;  %v1223_v40 = vadd.f32 %v1654_v48, %v1200_v62  ;;  %v2465_v43 = vadd.f32 %v1222_v16, %v2256_v47  ;;  %v1224_v11 = vadd.f32 %v1654_v48, %v1201_v14  ;;  %v1205_v30 = vld [vmem:[#allocation2 + $0x28] sm:$0xff] }
 0x262   : > { %v2457_v35 = vadd.f32 %v1220_v34, %v2247_v44  ;;  %v2462_v41 = vadd.f32 %v1221_v38, %v2253_v46  ;;  %v1225_v44 = vadd.f32 %v1654_v48, %v1202_v12  ;;  %v1226_v20 = vadd.f32 %v1654_v48, %v1203_v22  ;;  %v1204_v46 = vld [vmem:[#allocation2 + $0x78] sm:$0xff] }
 0x263   : > { %v2470_v51 = vadd.f32 %v1223_v40, %v2262_v49  ;;  %v2473_v17 = vadd.f32 %v1224_v11, %v2265_v50  ;;  %v1227_v33 = vadd.f32 %v1654_v48, %v1204_v46  ;;  %v1228_v1 = vadd.f32 %v1654_v48, %v1205_v30 }
 0x264   : > { %1247 = vadd.xlane.f32.xlu0 %v1230_v3  ;;  %1251 = vadd.xlane.f32.xlu1 %v1232_v5  ;;  %v2478_v47 = vadd.f32 %v1225_v44, %v2271_v52  ;;  %v2481_v25 = vadd.f32 %v1226_v20, %v2274_v53 }
 0x265   : > { %v2486_v49 = vadd.f32 %v1227_v33, %v2280_v55  ;;  %v2489_v50 = vadd.f32 %v1228_v1, %v2283_v56 }
 0x268   : > { %1253 = vadd.xlane.f32.xlu0 %v1233_v58  ;;  %1255 = vadd.xlane.f32.xlu1 %v2450_v9 }
 0x26c   : > { %1257 = vadd.xlane.f32.xlu0 %v2453_v61  ;;  %1259 = vadd.xlane.f32.xlu1 %v2457_v35 }
 0x270   : > { %1261 = vadd.xlane.f32.xlu0 %v2462_v41  ;;  %1263 = vadd.xlane.f32.xlu1 %v2465_v43 }
 0x274   : > { %1265 = vadd.xlane.f32.xlu0 %v2470_v51  ;;  %1267 = vadd.xlane.f32.xlu1 %v2473_v17 }
 0x278   : > { %1269 = vadd.xlane.f32.xlu0 %v2478_v47  ;;  %1271 = vadd.xlane.f32.xlu1 %v2481_v25 }
 0x27c   : > { %1273 = vadd.xlane.f32.xlu0 %v2486_v49  ;;  %1275 = vadd.xlane.f32.xlu1 %v2489_v50 }
 0x2e9   : > { %v1246_v52 = vpop.xlane.xlu0 %1245  ;;  %v1250_v28 = vpop.xlane.xlu1 %1249 }
 0x2ea   : > { %v1278_v29 = vmul.f32 0.0078125, %v1246_v52  ;;  %v1280_v53 = vmul.f32 0.0078125, %v1250_v28 }
 0x2ec   : > { %v2493_v23 = vsub.f32 %v1229_v19, %v1278_v29  ;;  %v2495_v24 = vsub.f32 %v1231_v2, %v1280_v53 }
 0x2ed   : > { %v1248_v31 = vpop.xlane.xlu0 %1247  ;;  %v1252_v32 = vpop.xlane.xlu1 %1251 }
 0x2ee   : > { %v1279_v36 = vmul.f32 0.0078125, %v1248_v31  ;;  %v1310_v55 = vmul.f32 %v2493_v23, %v2493_v23  ;;  %v1281_v56 = vmul.f32 0.0078125, %v1252_v32  ;;  %v1312_v18 = vmul.f32 %v2495_v24, %v2495_v24 }
 0x2f0   : > { %v2499_v13 = vsub.f32 %v1230_v3, %v1279_v36  ;;  %1326 = vadd.xlane.f32.xlu0 %v1310_v55  ;;  %v2501_v21 = vsub.f32 %v1232_v5, %v1281_v56 }
 0x2f1   : > { %v1254_v27 = vpop.xlane.xlu0 %1253  ;;  %v1256_v10 = vpop.xlane.xlu1 %1255 }
 0x2f2   : > { %v1282_v48 = vmul.f32 0.0078125, %v1254_v27  ;;  %v1311_v57 = vmul.f32 %v2499_v13, %v2499_v13  ;;  %v1283_v7 = vmul.f32 0.0078125, %v1256_v10  ;;  %v1313_v42 = vmul.f32 %v2501_v21, %v2501_v21 }
 0x2f4   : > { %v2507_v54 = vsub.f32 %v1233_v58, %v1282_v48  ;;  %1330 = vadd.xlane.f32.xlu0 %v1312_v18  ;;  %1328 = vadd.xlane.f32.xlu1 %v1311_v57  ;;  %v2510_v59 = vsub.f32 %v2450_v9, %v1283_v7 }
 0x2f5   : > { %v1258_v60 = vpop.xlane.xlu0 %1257  ;;  %v1260_v63 = vpop.xlane.xlu1 %1259 }
 0x2f6   : > { %v1284_v45 = vmul.f32 0.0078125, %v1258_v60  ;;  %v1314_v0 = vmul.f32 %v2507_v54, %v2507_v54  ;;  %v1285_v19 = vmul.f32 0.0078125, %v1260_v63  ;;  %v1315_v3 = vmul.f32 %v2510_v59, %v2510_v59 }
 0x2f8   : > { %v2517_v2 = vsub.f32 %v2453_v61, %v1284_v45  ;;  %1332 = vadd.xlane.f32.xlu1 %v1313_v42  ;;  %1334 = vadd.xlane.f32.xlu0 %v1314_v0  ;;  %v2520_v4 = vsub.f32 %v2457_v35, %v1285_v19 }
 0x2f9   : > { %v1262_v5 = vpop.xlane.xlu0 %1261  ;;  %v1264_v15 = vpop.xlane.xlu1 %1263 }
 0x2fa   : > { %v1286_v6 = vmul.f32 0.0078125, %v1262_v5  ;;  %v1316_v26 = vmul.f32 %v2517_v2, %v2517_v2  ;;  %v1287_v8 = vmul.f32 0.0078125, %v1264_v15  ;;  %v1317_v34 = vmul.f32 %v2520_v4, %v2520_v4 }
 0x2fc   : > { %v2527_v58 = vsub.f32 %v2462_v41, %v1286_v6  ;;  %1336 = vadd.xlane.f32.xlu1 %v1315_v3  ;;  %1338 = vadd.xlane.f32.xlu0 %v1316_v26  ;;  %v2530_v9 = vsub.f32 %v2465_v43, %v1287_v8  ;;  %v2571_v8 = vld [vmem:[%s2671_s5] ss:$0 sm:$0xff] }
 0x2fd   : > { %v1266_v37 = vpop.xlane.xlu0 %1265  ;;  %v1268_v39 = vpop.xlane.xlu1 %1267 }
 0x2fe   : > { %v1288_v61 = vmul.f32 0.0078125, %v1266_v37  ;;  %v1318_v35 = vmul.f32 %v2527_v58, %v2527_v58  ;;  %v1289_v38 = vmul.f32 0.0078125, %v1268_v39  ;;  %v1319_v14 = vmul.f32 %v2530_v9, %v2530_v9 }
 0x300   : > { %v2537_v16 = vsub.f32 %v2470_v51, %v1288_v61  ;;  %1340 = vadd.xlane.f32.xlu1 %v1317_v34  ;;  %1342 = vadd.xlane.f32.xlu0 %v1318_v35  ;;  %v2540_v62 = vsub.f32 %v2473_v17, %v1289_v38  ;;  %v2577_v61 = vld [vmem:[%s2672_s6] ss:$0 sm:$0xff] }
 0x301   : > { %v1270_v40 = vpop.xlane.xlu0 %1269  ;;  %v1272_v41 = vpop.xlane.xlu1 %1271 }
 0x302   : > { %v1290_v43 = vmul.f32 0.0078125, %v1270_v40  ;;  %v1320_v11 = vmul.f32 %v2537_v16, %v2537_v16  ;;  %v1291_v12 = vmul.f32 0.0078125, %v1272_v41  ;;  %v1321_v51 = vmul.f32 %v2540_v62, %v2540_v62 }
 0x304   : > { %v2547_v22 = vsub.f32 %v2478_v47, %v1290_v43  ;;  %1344 = vadd.xlane.f32.xlu1 %v1319_v14  ;;  %1346 = vadd.xlane.f32.xlu0 %v1320_v11  ;;  %v2550_v44 = vsub.f32 %v2481_v25, %v1291_v12 }
 0x305   : > { %v1274_v17 = vpop.xlane.xlu0 %1273  ;;  %v1276_v20 = vpop.xlane.xlu1 %1275 }
 0x306   : > { %v1292_v46 = vmul.f32 0.0078125, %v1274_v17  ;;  %v1322_v30 = vmul.f32 %v2547_v22, %v2547_v22  ;;  %v1293_v33 = vmul.f32 0.0078125, %v1276_v20  ;;  %v1323_v25 = vmul.f32 %v2550_v44, %v2550_v44 }
 0x308   : > { %v2557_v1 = vsub.f32 %v2486_v49, %v1292_v46  ;;  %1348 = vadd.xlane.f32.xlu1 %v1321_v51  ;;  %1350 = vadd.xlane.f32.xlu0 %v1322_v30  ;;  %v2560_v47 = vsub.f32 %v2489_v50, %v1293_v33 }
 0x30a   : > { %v1324_v52 = vmul.f32 %v2557_v1, %v2557_v1  ;;  %v1325_v28 = vmul.f32 %v2560_v47, %v2560_v47 }
 0x30c   : > { %1352 = vadd.xlane.f32.xlu1 %v1323_v25  ;;  %1354 = vadd.xlane.f32.xlu0 %v1324_v52 }
 0x310   : > { %1356 = vadd.xlane.f32.xlu1 %v1325_v28 }
 0x379   : > { %v1327_v29 = vpop.xlane.xlu0 %1326 }
 0x37a   : > { %v1358_v49 = vmul.f32 0.0078125, %v1327_v29 }
 0x37c   : > { %v1374_v53 = vadd.f32 1e-12, %v1358_v49 }
 0x37d   : > { %v1329_v31 = vpop.xlane.xlu1 %1328  ;;  %v1331_v32 = vpop.xlane.xlu0 %1330 }
 0x37e   : > { %1899 = vrsqrt.f32 %v1374_v53  ;;  %v1359_v50 = vmul.f32 0.0078125, %v1329_v31  ;;  %v1360_v36 = vmul.f32 0.0078125, %v1331_v32 }
 0x380   : > { %v1375_v55 = vadd.f32 1e-12, %v1359_v50  ;;  %v1376_v56 = vadd.f32 1e-12, %v1360_v36 }
 0x381   : > { %v1333_v18 = vpop.xlane.xlu1 %1332  ;;  %v1335_v27 = vpop.xlane.xlu0 %1334 }
 0x382   : > { %1901 = vrsqrt.f32 %v1375_v55  ;;  %v1361_v10 = vmul.f32 0.0078125, %v1333_v18  ;;  %v1362_v48 = vmul.f32 0.0078125, %v1335_v27 }
 0x383   : > { %1903 = vrsqrt.f32 %v1376_v56 }
 0x384   : > { %v1377_v57 = vadd.f32 1e-12, %v1361_v10  ;;  %v1378_v7 = vadd.f32 1e-12, %v1362_v48 }
 0x385   : > { %v1337_v42 = vpop.xlane.xlu1 %1336  ;;  %v1339_v60 = vpop.xlane.xlu0 %1338 }
 0x386   : > { %1905 = vrsqrt.f32 %v1377_v57  ;;  %v1363_v63 = vmul.f32 0.0078125, %v1337_v42  ;;  %v1364_v45 = vmul.f32 0.0078125, %v1339_v60 }
 0x387   : > { %1907 = vrsqrt.f32 %v1378_v7 }
 0x388   : > { %v1379_v0 = vadd.f32 1e-12, %v1363_v63  ;;  %v1380_v19 = vadd.f32 1e-12, %v1364_v45 }
 0x389   : > { %v1341_v3 = vpop.xlane.xlu1 %1340  ;;  %v1343_v5 = vpop.xlane.xlu0 %1342 }
 0x38a   : > { %1909 = vrsqrt.f32 %v1379_v0  ;;  %v1365_v15 = vmul.f32 0.0078125, %v1341_v3  ;;  %v1366_v6 = vmul.f32 0.0078125, %v1343_v5 }
 0x38b   : > { %v1900_v26 = vpop.eup %1899  ;;  %1911 = vrsqrt.f32 %v1380_v19 }
 0x38c   : > { %v1406_v34 = vmul.f32 %v1900_v26, %v2493_v23  ;;  %v1381_v37 = vadd.f32 1e-12, %v1365_v15  ;;  %v1382_v39 = vadd.f32 1e-12, %v1366_v6 }
 0x38d   : > { %v1345_v35 = vpop.xlane.xlu1 %1344  ;;  %v1347_v38 = vpop.xlane.xlu0 %1346 }
 0x38e   : > { %v1429_v14 = vmul.f32 %v2571_v8, %v1406_v34  ;;  %1913 = vrsqrt.f32 %v1381_v37  ;;  %v1367_v40 = vmul.f32 0.0078125, %v1345_v35  ;;  %v1368_v41 = vmul.f32 0.0078125, %v1347_v38 }
 0x38f   : > { %v1902_v43 = vpop.eup %1901  ;;  %1915 = vrsqrt.f32 %v1382_v39 }
 0x390   : > { %v1904_v11 = vpop.eup %1903  ;;  %v1452_v23 = vadd.f32 %v2577_v61, %v1429_v14  ;;  %v1407_v12 = vmul.f32 %v1902_v43, %v2499_v13  ;;  %v1383_v51 = vadd.f32 1e-12, %v1367_v40  ;;  %v1384_v17 = vadd.f32 1e-12, %v1368_v41 }
 0x391   : > { %v1408_v20 = vmul.f32 %v1904_v11, %v2495_v24  ;;  %v1349_v46 = vpop.xlane.xlu1 %1348  ;;  %v1351_v30 = vpop.xlane.xlu0 %1350 }
 0x392   : > { %1468 = vst [vmem:[%s2196_s28] sm:$0xff] %v1452_v23  ;;  %v1430_v33 = vmul.f32 %v2571_v8, %v1407_v12  ;;  %1917 = vrsqrt.f32 %v1383_v51  ;;  %v1369_v25 = vmul.f32 0.0078125, %v1349_v46  ;;  %v1370_v52 = vmul.f32 0.0078125, %v1351_v30 }
 0x393   : > { %v1906_v28 = vpop.eup %1905  ;;  %v1431_v29 = vmul.f32 %v2571_v8, %v1408_v20  ;;  %1919 = vrsqrt.f32 %v1384_v17 }
 0x394   : > { %v1908_v49 = vpop.eup %1907  ;;  %v1453_v13 = vadd.f32 %v2577_v61, %v1430_v33  ;;  %v1409_v53 = vmul.f32 %v1906_v28, %v2501_v21  ;;  %v1385_v24 = vadd.f32 1e-12, %v1369_v25  ;;  %v1386_v31 = vadd.f32 1e-12, %v1370_v52 }
 0x395   : > { %v1454_v32 = vadd.f32 %v2577_v61, %v1431_v29  ;;  %v1410_v50 = vmul.f32 %v1908_v49, %v2507_v54  ;;  %v1353_v36 = vpop.xlane.xlu1 %1352  ;;  %v1355_v55 = vpop.xlane.xlu0 %1354 }
 0x396   : > { %1469 = vst [vmem:[%s2196_s28 + $0x8] sm:$0xff] %v1453_v13  ;;  %v1432_v56 = vmul.f32 %v2571_v8, %v1409_v53  ;;  %1921 = vrsqrt.f32 %v1385_v24  ;;  %v1371_v18 = vmul.f32 0.0078125, %v1353_v36  ;;  %v1372_v27 = vmul.f32 0.0078125, %v1355_v55 }
 0x397   : > { %v1910_v10 = vpop.eup %1909  ;;  %1470 = vst [vmem:[%s2196_s28 + $0x10] sm:$0xff] %v1454_v32  ;;  %v1433_v21 = vmul.f32 %v2571_v8, %v1410_v50  ;;  %1923 = vrsqrt.f32 %v1386_v31 }
 0x398   : > { %v1912_v48 = vpop.eup %1911  ;;  %v1455_v57 = vadd.f32 %v2577_v61, %v1432_v56  ;;  %v1411_v54 = vmul.f32 %v1910_v10, %v2510_v59  ;;  %v1387_v7 = vadd.f32 1e-12, %v1371_v18  ;;  %v1388_v42 = vadd.f32 1e-12, %v1372_v27 }
 0x399   : > { %v1456_v60 = vadd.f32 %v2577_v61, %v1433_v21  ;;  %v1412_v63 = vmul.f32 %v1912_v48, %v2517_v2  ;;  %v1357_v45 = vpop.xlane.xlu1 %1356 }
 0x39a   : > { %1471 = vst [vmem:[%s2196_s28 + $0x18] sm:$0xff] %v1455_v57  ;;  %v1434_v0 = vmul.f32 %v2571_v8, %v1411_v54  ;;  %1925 = vrsqrt.f32 %v1387_v7  ;;  %v1373_v19 = vmul.f32 0.0078125, %v1357_v45 }
 0x39b   : > { %v1914_v3 = vpop.eup %1913  ;;  %1472 = vst [vmem:[%s2196_s28 + $0x20] sm:$0xff] %v1456_v60  ;;  %v1435_v5 = vmul.f32 %v2571_v8, %v1412_v63  ;;  %1927 = vrsqrt.f32 %v1388_v42 }
 0x39c   : > { %v1916_v59 = vpop.eup %1915  ;;  %v1457_v15 = vadd.f32 %v2577_v61, %v1434_v0  ;;  %v1413_v6 = vmul.f32 %v1914_v3, %v2520_v4  ;;  %v1389_v2 = vadd.f32 1e-12, %v1373_v19 }
 0x39d   : > { %v1458_v26 = vadd.f32 %v2577_v61, %v1435_v5  ;;  %v1414_v34 = vmul.f32 %v1916_v59, %v2527_v58 }
 0x39e   : > { %1473 = vst [vmem:[%s2196_s28 + $0x28] sm:$0xff] %v1457_v15  ;;  %v1436_v37 = vmul.f32 %v2571_v8, %v1413_v6  ;;  %1929 = vrsqrt.f32 %v1389_v2 }
 0x39f   : > { %v1918_v39 = vpop.eup %1917  ;;  %1474 = vst [vmem:[%s2196_s28 + $0x30] sm:$0xff] %v1458_v26  ;;  %v1437_v35 = vmul.f32 %v2571_v8, %v1414_v34 }
 0x3a0   : > { %v1920_v38 = vpop.eup %1919  ;;  %v1459_v14 = vadd.f32 %v2577_v61, %v1436_v37  ;;  %v1415_v4 = vmul.f32 %v1918_v39, %v2530_v9 }
 0x3a1   : > { %v1460_v40 = vadd.f32 %v2577_v61, %v1437_v35  ;;  %v1416_v41 = vmul.f32 %v1920_v38, %v2537_v16 }
 0x3a2   : > { %1475 = vst [vmem:[%s2196_s28 + $0x38] sm:$0xff] %v1459_v14  ;;  %v1438_v58 = vmul.f32 %v2571_v8, %v1415_v4 }
 0x3a3   : > { %v1922_v43 = vpop.eup %1921  ;;  %1476 = vst [vmem:[%s2196_s28 + $0x40] sm:$0xff] %v1460_v40  ;;  %v1439_v11 = vmul.f32 %v2571_v8, %v1416_v41 }
 0x3a4   : > { %v1924_v23 = vpop.eup %1923  ;;  %v1461_v12 = vadd.f32 %v2577_v61, %v1438_v58  ;;  %v1417_v51 = vmul.f32 %v1922_v43, %v2540_v62 }
 0x3a5   : > { %v1462_v9 = vadd.f32 %v2577_v61, %v1439_v11  ;;  %v1418_v17 = vmul.f32 %v1924_v23, %v2547_v22 }
 0x3a6   : > { %1477 = vst [vmem:[%s2196_s28 + $0x48] sm:$0xff] %v1461_v12  ;;  %v1440_v16 = vmul.f32 %v2571_v8, %v1417_v51 }
 0x3a7   : > { %v1926_v20 = vpop.eup %1925  ;;  %1478 = vst [vmem:[%s2196_s28 + $0x50] sm:$0xff] %v1462_v9  ;;  %v1441_v46 = vmul.f32 %v2571_v8, %v1418_v17 }
 0x3a8   : > { %v1928_v30 = vpop.eup %1927  ;;  %v1463_v33 = vadd.f32 %v2577_v61, %v1440_v16  ;;  %v1419_v62 = vmul.f32 %v1926_v20, %v2550_v44 }
 0x3a9   : > { %v1464_v25 = vadd.f32 %v2577_v61, %v1441_v46  ;;  %v1420_v52 = vmul.f32 %v1928_v30, %v2557_v1 }
 0x3aa   : > { %1479 = vst [vmem:[%s2196_s28 + $0x58] sm:$0xff] %v1463_v33  ;;  %v1442_v22 = vmul.f32 %v2571_v8, %v1419_v62 }
 0x3ab   : > { %v1930_v28 = vpop.eup %1929  ;;  %1480 = vst [vmem:[%s2196_s28 + $0x60] sm:$0xff] %v1464_v25  ;;  %v1443_v29 = vmul.f32 %v2571_v8, %v1420_v52 }
 0x3ac   : > { %v1465_v49 = vadd.f32 %v2577_v61, %v1442_v22  ;;  %v1421_v13 = vmul.f32 %v1930_v28, %v2560_v47 }
 0x3ad   : > { %v1466_v53 = vadd.f32 %v2577_v61, %v1443_v29 }
 0x3ae   : > { %1481 = vst [vmem:[%s2196_s28 + $0x68] sm:$0xff] %v1465_v49  ;;  %v1444_v44 = vmul.f32 %v2571_v8, %v1421_v13 }
 0x3af   : > { %1482 = vst [vmem:[%s2196_s28 + $0x70] sm:$0xff] %v1466_v53 }
 0x3b0   : > { %v1467_v24 = vadd.f32 %v2577_v61, %v1444_v44 }
 0x3b2   : > { %1483 = vst [vmem:[%s2196_s28 + $0x78] sm:$0xff] %v1467_v24 }
 0x3b3 PF: > { %s20_s8 = sadd.s32 1, %s2023_s8   ;;  %s2679_s20 = sld [smem:[#allocation7_spill]] }
 0x3b4   : > { %p17_p10 = scmp.ge.s32.totalorder %s20_s8, 6   ;;  %s2680_s24 = smov %s1999_s25 }
 0x3b5   : > { %s2681_s25 = smov %s2003_s26  ;;  %s2682_s26 = smov %s2128_s15 }
 0x3b6   : > { %s2683_s27 = smov %s2015_s29  ;;  %s2684_s28 = smov %s2019_s30 }
 0x3b7   : > { %s2685_s29 = smov %s2688_s10  ;;  %19 = sbr.rel (!%p17_p10) target bundleno = 7 (0x7), region = 148 }
 0x3b9   : > { %s2686_s30 = smov %s2679_s20 }
 0x3bc   :  { %1506 = vsyncpa [#allocation5], 1 }
 0x3bd   :  { %1508 = vsyncpa [#allocation5 + $0x1], 1 }

</bundles_post_ra>
